<compile_context>
chip_gen: v6e
topology: v6e:2x2x1
jax: 0.10.0
libtpu: 0.0.40
codegen_flags: <defaults>
</compile_context>

<pallas_src>
import functools

import jax
import jax.numpy as jnp
from jax.experimental import pallas as pl
from jax.experimental.pallas import tpu as pltpu


# ----------------------------------------------------------------------------
# Kernel
# ----------------------------------------------------------------------------
def gru_kernel(x_ref, w_ih_t_ref, w_hh_t_ref, b_ih_ref, b_hh_ref,
               w_out_t_ref, b_out_ref, out_ref,
               gi_ref, h_ref, mx_ref,
               *, seq_len, time_chunk, batch_tile, hidden_pad):
    """Grid = (batch_tiles, time_chunks).

    x_ref      : (Tc, Bt, Dp)  bf16 embeddings for this (batch tile, time chunk)
    w_ih_t_ref : (Dp, 3*Hp)    bf16 input->gates weights (transposed, per-gate padded)
    w_hh_t_ref : (Hp, 3*Hp)    bf16 hidden->gates weights
    b_ih_ref   : (1, 3*Hp)     f32
    b_hh_ref   : (1, 3*Hp)     f32
    w_out_t_ref: (Hp, Cp)      bf16 classifier weights
    b_out_ref  : (1, Cp)       f32
    out_ref    : (Bt, Cp)      f32 logits (lane-dense padded block)
    gi_ref     : (Tc*Bt, 3*Hp) f32 scratch, per-chunk input projections
    h_ref/mx_ref: (Bt, Hp)     f32 scratch carried across time chunks
    """
    Tc, Bt, Hp = time_chunk, batch_tile, hidden_pad
    tc = pl.program_id(1)
    n_chunks = pl.num_programs(1)

    # ---- init carried state at the first time chunk of each batch tile ----
    @pl.when(tc == 0)
    def _():
        h_ref[...] = jnp.zeros_like(h_ref)
        mx_ref[...] = jnp.full_like(mx_ref, -jnp.inf)

    # ---- input projection for the whole chunk: one big MXU matmul (no h dependence) ----
    # (Tc, Bt, Dp) -> (Tc*Bt, Dp) is a tile-aligned collapse (Bt % 16 == 0, Dp % 128 == 0).
    x_all = x_ref[...].reshape(Tc * Bt, x_ref.shape[-1])                 # bf16
    gi_ref[...] = (jnp.dot(x_all, w_ih_t_ref[...],
                           preferred_element_type=jnp.float32)
                   + b_ih_ref[...])                                      # (Tc*Bt, 3Hp) f32

    # Loop-invariant loads / broadcasts hoisted out of the serial recurrence.
    w_hh_t = w_hh_t_ref[...]                                             # (Hp, 3Hp) bf16
    b_hh_b = jnp.broadcast_to(b_hh_ref[...], (Bt, 3 * Hp))               # (Bt, 3Hp) f32

    def step(t, carry):
        h, mx = carry                                                    # f32 (Bt, Hp)
        row = pl.multiple_of(t * Bt, Bt)                                 # aligned slice start
        gi = gi_ref[pl.ds(row, Bt), :]                                   # (Bt, 3Hp)
        gh = jnp.dot(h.astype(w_hh_t.dtype), w_hh_t,
                     preferred_element_type=jnp.float32) + b_hh_b        # (Bt, 3Hp)

        # 128-lane-aligned gate views (Hp % 128 == 0) -> free slices, no lane shuffles.
        i_r, i_z, i_n = gi[:, :Hp], gi[:, Hp:2 * Hp], gi[:, 2 * Hp:]
        h_r, h_z, h_n = gh[:, :Hp], gh[:, Hp:2 * Hp], gh[:, 2 * Hp:]

        r = jax.nn.sigmoid(i_r + h_r)
        z = jax.nn.sigmoid(i_z + h_z)
        n = jnp.tanh(i_n + r * h_n)
        h_new = n + z * (h - n)                 # == (1-z)*n + z*h, one fewer VPU mul

        # Mask timesteps past seq_len (only the last, possibly ragged, chunk).
        valid = (tc * Tc + t) < seq_len
        h_new = jnp.where(valid, h_new, h)
        mx_new = jnp.where(valid, jnp.maximum(mx, h_new), mx)
        return h_new, mx_new

    unroll = True if Tc <= 8 else 4             # modest unroll: avoid vreg spills at big Bt
    h, mx = jax.lax.fori_loop(0, Tc, step, (h_ref[...], mx_ref[...]), unroll=unroll)
    h_ref[...] = h
    mx_ref[...] = mx

    # ---- classifier head, only on the last time chunk ----
    @pl.when(tc == n_chunks - 1)
    def _():
        pooled = jnp.tanh(mx_ref[...])                                   # (Bt, Hp) f32
        logits = jnp.dot(pooled.astype(w_out_t_ref.dtype), w_out_t_ref[...],
                         preferred_element_type=jnp.float32) + b_out_ref[...]
        out_ref[...] = logits.astype(out_ref.dtype)


# ----------------------------------------------------------------------------
# Wrapper helpers
# ----------------------------------------------------------------------------
def _round_up(x, m):
    return ((x + m - 1) // m) * m


def _vmem_capacity_bytes():
    try:
        return int(pltpu.get_tpu_info().vmem_capacity_bytes)
    except Exception:
        return 64 * 1024 * 1024   # conservative (v7x physical)


def _num_tensorcores():
    try:
        return max(1, int(getattr(pltpu.get_tpu_info(), "num_cores", 1)))
    except Exception:
        return 1


def _pack_gate_mat(w, H, Hp, K, Kp, dtype):
    """PyTorch (3H, K) gate-stacked weight -> (Kp, 3*Hp) transposed, per-gate Hp-padded."""
    blocks = []
    for g in range(3):
        wg = jnp.asarray(w[g * H:(g + 1) * H, :], jnp.float32).T         # (K, H)
        blocks.append(jnp.pad(wg, ((0, Kp - K), (0, Hp - H))))
    return jnp.concatenate(blocks, axis=1).astype(dtype)                 # (Kp, 3*Hp)


def _pack_gate_bias(b, H, Hp):
    blocks = [jnp.pad(jnp.asarray(b[g * H:(g + 1) * H], jnp.float32), (0, Hp - H))
              for g in range(3)]
    return jnp.concatenate(blocks).reshape(1, 3 * Hp)                    # f32


# ----------------------------------------------------------------------------
# Forward
# ----------------------------------------------------------------------------
def gru_forward(tokens, params, *, batch_tile=None, time_chunk=None,
                compute_dtype=jnp.bfloat16):
    """tokens: (T, B) int32 (seq-first, nn.GRU default).  Returns logits (B, C)."""
    embed_table = params["embed"]          # (V, D)
    w_ih = params["w_ih"]                  # (3H, D)
    w_hh = params["w_hh"]                  # (3H, H)
    b_ih = params["b_ih"]                  # (3H,)
    b_hh = params["b_hh"]                  # (3H,)
    w_out = params["w_out"]                # (C, H)
    b_out = params["b_out"]                # (C,)

    T, B = tokens.shape
    assert T >= 1, "empty sequence: max-pool over time is undefined for T == 0"
    D = embed_table.shape[1]
    H = w_hh.shape[1]
    C = w_out.shape[0]

    Dp = _round_up(D, 128)                 # lane-dense K dim of the input matmul
    Hp = _round_up(H, 128)                 # lane-align each gate
    Cp = _round_up(C, 128)                 # lane-dense logits block
    itm = jnp.dtype(compute_dtype).itemsize

    # ---- device-aware tile sizing ----
    n_cores = _num_tensorcores()
    if batch_tile is None:
        per_core = -(-B // n_cores)                       # keep >=1 tile per TensorCore
        batch_tile = min(_round_up(per_core, 16), 256)    # 16: bf16 sublane packing
    Bt = batch_tile
    Bp = _round_up(B, Bt)
    n_tiles = Bp // Bt

    vmem_cap = _vmem_capacity_bytes()
    if time_chunk is None:
        budget = max(vmem_cap // 4, 8 * 2 ** 20)          # chunk streaming budget
        per_step = Bt * (2 * Dp * itm + 3 * Hp * 4)       # x (2-buf) + gi per timestep
        time_chunk = int(max(1, min(T, budget // per_step, 64)))
    Tc = time_chunk
    n_chunks = -(-T // Tc)
    Tp = n_chunks * Tc

    # Embedding lookup (gather) stays in plain JAX glue; no transpose of activations.
    # TODO(synk): fuse the gather into the kernel (scalar-prefetch token ids + pl.Element
    # row gather, or per-chunk manual DMA gather) to remove the (T,B,D) HBM round trip.
    x_emb = jnp.take(embed_table, tokens, axis=0).astype(compute_dtype)  # (T, B, D)
    x_emb = jnp.pad(x_emb, ((0, Tp - T), (0, Bp - B), (0, Dp - D)))      # zero pads

    # Pre-transposed, per-gate lane-padded weights. All padding is exactly zero
    # (required: keeps padded lanes of h at 0 and out of the logits).
    w_ih_t = _pack_gate_mat(w_ih, H, Hp, D, Dp, compute_dtype)           # (Dp, 3Hp)
    w_hh_t = _pack_gate_mat(w_hh, H, Hp, H, Hp, compute_dtype)           # (Hp, 3Hp)
    b_ih_p = _pack_gate_bias(b_ih, H, Hp)                                # (1, 3Hp) f32
    b_hh_p = _pack_gate_bias(b_hh, H, Hp)                                # (1, 3Hp) f32
    w_out_t = jnp.pad(jnp.asarray(w_out, jnp.float32).T,
                      ((0, Hp - H), (0, Cp - C))).astype(compute_dtype)  # (Hp, Cp)
    b_out_p = jnp.pad(jnp.asarray(b_out, jnp.float32), (0, Cp - C)).reshape(1, Cp)

    kernel = functools.partial(gru_kernel, seq_len=T, time_chunk=Tc,
                               batch_tile=Bt, hidden_pad=Hp)

    # VMEM footprint estimate -> vmem_limit_bytes (cap at v7x physical 64 MiB).
    est = (2 * Tc * Bt * Dp * itm                 # double-buffered x chunk
           + Tc * Bt * 3 * Hp * 4                 # gi scratch
           + 2 * Bt * Hp * 4                      # h + mx scratch
           + 2 * (Dp + Hp) * 3 * Hp * itm         # gate weights (double-buffered)
           + 2 * Hp * Cp * itm                    # head weights
           + 2 * Bt * Cp * 4                      # output block
           + 4 * (3 * Hp + Cp) * 4)               # biases
    vmem_limit = int(min(64 * 2 ** 20, max(32 * 2 ** 20, 2 * est)))

    out_padded = pl.pallas_call(
        kernel,
        out_shape=jax.ShapeDtypeStruct((Bp, Cp), jnp.float32),
        grid_spec=pltpu.PrefetchScalarGridSpec(
            num_scalar_prefetch=0,
            grid=(n_tiles, n_chunks),
            in_specs=[
                pl.BlockSpec((Tc, Bt, Dp), lambda b, t: (t, b, 0)),   # embeddings chunk
                pl.BlockSpec((Dp, 3 * Hp), lambda b, t: (0, 0)),      # w_ih_t (invariant)
                pl.BlockSpec((Hp, 3 * Hp), lambda b, t: (0, 0)),      # w_hh_t (invariant)
                pl.BlockSpec((1, 3 * Hp), lambda b, t: (0, 0)),       # b_ih
                pl.BlockSpec((1, 3 * Hp), lambda b, t: (0, 0)),       # b_hh
                pl.BlockSpec((Hp, Cp), lambda b, t: (0, 0)),          # w_out_t
                pl.BlockSpec((1, Cp), lambda b, t: (0, 0)),           # b_out
            ],
            out_specs=pl.BlockSpec((Bt, Cp), lambda b, t: (b, 0)),
            scratch_shapes=[
                pltpu.VMEM((Tc * Bt, 3 * Hp), jnp.float32),  # gi for current chunk
                pltpu.VMEM((Bt, Hp), jnp.float32),           # h (carried across chunks)
                pltpu.VMEM((Bt, Hp), jnp.float32),           # running max over time
            ],
        ),
        compiler_params=pltpu.CompilerParams(
            # Batch tiles independent -> shard across TensorCores; time axis is serial.
            dimension_semantics=("parallel", "arbitrary"),
            vmem_limit_bytes=vmem_limit),
    )(x_emb, w_ih_t, w_hh_t, b_ih_p, b_hh_p, w_out_t, b_out_p)

    return out_padded[:B, :C]


# ----------------------------------------------------------------------------
# Pure-JAX reference (mirrors the PyTorch module in eval mode, f32)
# ----------------------------------------------------------------------------
def _reference_forward(tokens, params):
    x = jnp.take(params["embed"], tokens, axis=0).astype(jnp.float32)   # (T, B, D)
    H = params["w_hh"].shape[1]
    h = jnp.zeros((tokens.shape[1], H), jnp.float32)

    def step(h, x_t):
        gi = x_t @ params["w_ih"].T + params["b_ih"]
        gh = h @ params["w_hh"].T + params["b_hh"]
        i_r, i_z, i_n = gi[:, :H], gi[:, H:2 * H], gi[:, 2 * H:]
        h_r, h_z, h_n = gh[:, :H], gh[:, H:2 * H], gh[:, 2 * H:]
        r = jax.nn.sigmoid(i_r + h_r)
        z = jax.nn.sigmoid(i_z + h_z)
        n = jnp.tanh(i_n + r * h_n)
        h_new = (1.0 - z) * n + z * h
        return h_new, h_new

    _, hs = jax.lax.scan(step, h, x)            # (T, B, H)
    pooled = jnp.tanh(jnp.max(hs, axis=0))      # max_pool1d over T, then tanh
    return pooled @ params["w_out"].T + params["b_out"]


if __name__ == "__main__":
    # Small, forward-implied shapes.
    V, D, H, C = 100, 32, 32, 4      # embed_num, embed_dim, lstm_hidden_dim, class_num
    T, B = 8, 8                      # seq_len, batch
    # NOTE: single-layer GRU; nn.GRU dropout and self.dropout are no-ops here (eval / 1 layer).
    # TODO(synk): multi-layer GRU stacking not implemented (single-layer recurrence only).

    key = jax.random.PRNGKey(0)
    k_emb, k_wih, k_whh, k_bih, k_bhh, k_wo, k_bo, k_tok = jax.random.split(key, 8)

    scale = 1.0 / jnp.sqrt(H)
    params = {
        "embed": jax.random.normal(k_emb, (V, D), jnp.float32) * 0.1,
        "w_ih": jax.random.uniform(k_wih, (3 * H, D), jnp.float32, -scale, scale),
        "w_hh": jax.random.uniform(k_whh, (3 * H, H), jnp.float32, -scale, scale),
        "b_ih": jax.random.uniform(k_bih, (3 * H,), jnp.float32, -scale, scale),
        "b_hh": jax.random.uniform(k_bhh, (3 * H,), jnp.float32, -scale, scale),
        "w_out": jax.random.uniform(k_wo, (C, H), jnp.float32, -scale, scale),
        "b_out": jax.random.uniform(k_bo, (C,), jnp.float32, -scale, scale),
    }
    tokens = jax.random.randint(k_tok, (T, B), 0, V, jnp.int32)

    logits = gru_forward(tokens, params)
    logits = jax.block_until_ready(logits)

    ref = _reference_forward(tokens, params)
    assert logits.shape == (B, C)
    # bf16 MXU operands => loosened tolerance vs the pure-f32 reference.
    assert jnp.allclose(logits, ref, atol=3e-2, rtol=3e-2), "mismatch vs reference"

    print("KERNEL_OK")
</pallas_src>

<mosaic_0001>
module attributes {stable_mosaic.version = 11 : i64} {
  func.func @gru_kernel(%arg0: i32, %arg1: i32, %arg2: memref<8x16x128xbf16, #tpu.memory_space<vmem>>, %arg3: memref<128x384xbf16, #tpu.memory_space<vmem>>, %arg4: memref<128x384xbf16, #tpu.memory_space<vmem>>, %arg5: memref<1x384xf32, #tpu.memory_space<vmem>>, %arg6: memref<1x384xf32, #tpu.memory_space<vmem>>, %arg7: memref<128x128xbf16, #tpu.memory_space<vmem>>, %arg8: memref<1x128xf32, #tpu.memory_space<vmem>>, %arg9: memref<16x128xf32, #tpu.memory_space<vmem>>, %arg10: memref<128x384xf32, #tpu.memory_space<vmem>>, %arg11: memref<16x128xf32, #tpu.memory_space<vmem>>, %arg12: memref<16x128xf32, #tpu.memory_space<vmem>>) attributes {dimension_semantics = [#tpu.dimension_semantics<parallel>, #tpu.dimension_semantics<arbitrary>], iteration_bounds = array<i64: 1, 1>, scalar_prefetch = 0 : i64, scratch_operands = 3 : i64, tpu.core_type = #tpu.core_type<tc>, window_params = [{transform_indices = @transform_0, window_bounds = array<i64: 8, 16, 128>}, {pipeline_mode = #tpu.pipeline_mode<synchronous>, transform_indices = @transform_1, window_bounds = array<i64: 128, 384>}, {pipeline_mode = #tpu.pipeline_mode<synchronous>, transform_indices = @transform_2, window_bounds = array<i64: 128, 384>}, {pipeline_mode = #tpu.pipeline_mode<synchronous>, transform_indices = @transform_3, window_bounds = array<i64: 1, 384>}, {pipeline_mode = #tpu.pipeline_mode<synchronous>, transform_indices = @transform_4, window_bounds = array<i64: 1, 384>}, {pipeline_mode = #tpu.pipeline_mode<synchronous>, transform_indices = @transform_5, window_bounds = array<i64: 128, 128>}, {pipeline_mode = #tpu.pipeline_mode<synchronous>, transform_indices = @transform_6, window_bounds = array<i64: 1, 128>}, {transform_indices = @transform_7, window_bounds = array<i64: 16, 128>}]} {
    %c0_i32 = arith.constant 0 : i32
    %0 = arith.cmpi eq, %arg1, %c0_i32 : i32
    %1 = arith.extui %0 : i1 to i32
    %c0_i32_0 = arith.constant 0 : i32
    %2 = arith.cmpi ne, %1, %c0_i32_0 : i32
    scf.if %2 {
      %cst_79 = arith.constant 0.000000e+00 : f32
      %318 = vector.broadcast %cst_79 : f32 to vector<16x128xf32>
      %c0_80 = arith.constant 0 : index
      %c0_81 = arith.constant 0 : index
      %319 = vector.load %arg11[%c0_80, %c0_81] : memref<16x128xf32, #tpu.memory_space<vmem>>, vector<16x128xf32>
      tpu.vector_store %arg11[%c0_80, %c0_81], %318 {strides = array<i32>} : memref<16x128xf32, #tpu.memory_space<vmem>>, vector<16x128xf32>,
      %cst_82 = arith.constant 0xFF800000 : f32
      %320 = vector.broadcast %cst_82 : f32 to vector<16x128xf32>
      %c0_83 = arith.constant 0 : index
      %c0_84 = arith.constant 0 : index
      %321 = vector.load %arg12[%c0_83, %c0_84] : memref<16x128xf32, #tpu.memory_space<vmem>>, vector<16x128xf32>
      tpu.vector_store %arg12[%c0_83, %c0_84], %320 {strides = array<i32>} : memref<16x128xf32, #tpu.memory_space<vmem>>, vector<16x128xf32>,
    } else {
    }
    %c0 = arith.constant 0 : index
    %c0_1 = arith.constant 0 : index
    %c0_2 = arith.constant 0 : index
    %3 = vector.load %arg2[%c0, %c0_1, %c0_2] : memref<8x16x128xbf16, #tpu.memory_space<vmem>>, vector<8x16x128xbf16>
    %4 = vector.shape_cast %3 : vector<8x16x128xbf16> to vector<128x128xbf16>
    %c0_3 = arith.constant 0 : index
    %c0_4 = arith.constant 0 : index
    %5 = vector.load %arg3[%c0_3, %c0_4] : memref<128x384xbf16, #tpu.memory_space<vmem>>, vector<128x384xbf16>
    %cst = arith.constant dense<0.000000e+00> : vector<128x384xf32>
    %6 = tpu.matmul %4, %5, %cst {dimension_numbers = #tpu.dot_dimension_numbers<[1], [0], [0], [1], [0, 0, 1, 1], [], []>} : vector<128x128xbf16>, vector<128x384xbf16>, vector<128x384xf32> -> vector<128x384xf32>
    %c0_5 = arith.constant 0 : index
    %c0_6 = arith.constant 0 : index
    %7 = vector.load %arg5[%c0_5, %c0_6] : memref<1x384xf32, #tpu.memory_space<vmem>>, vector<1x384xf32>
    %8 = vector.broadcast %7 : vector<1x384xf32> to vector<128x384xf32>
    %9 = arith.addf %6, %8 : vector<128x384xf32>
    %c0_7 = arith.constant 0 : index
    %c0_8 = arith.constant 0 : index
    %10 = vector.load %arg10[%c0_7, %c0_8] : memref<128x384xf32, #tpu.memory_space<vmem>>, vector<128x384xf32>
    tpu.vector_store %arg10[%c0_7, %c0_8], %9 {strides = array<i32>} : memref<128x384xf32, #tpu.memory_space<vmem>>, vector<128x384xf32>,
    %c0_9 = arith.constant 0 : index
    %c0_10 = arith.constant 0 : index
    %11 = vector.load %arg4[%c0_9, %c0_10] : memref<128x384xbf16, #tpu.memory_space<vmem>>, vector<128x384xbf16>
    %c0_11 = arith.constant 0 : index
    %c0_12 = arith.constant 0 : index
    %12 = vector.load %arg6[%c0_11, %c0_12] : memref<1x384xf32, #tpu.memory_space<vmem>>, vector<1x384xf32>
    %13 = vector.shape_cast %12 : vector<1x384xf32> to vector<1x384xf32>
    %14 = vector.broadcast %13 : vector<1x384xf32> to vector<16x384xf32>
    %c0_13 = arith.constant 0 : index
    %c0_14 = arith.constant 0 : index
    %15 = vector.load %arg11[%c0_13, %c0_14] : memref<16x128xf32, #tpu.memory_space<vmem>>, vector<16x128xf32>
    %c0_15 = arith.constant 0 : index
    %c0_16 = arith.constant 0 : index
    %16 = vector.load %arg12[%c0_15, %c0_16] : memref<16x128xf32, #tpu.memory_space<vmem>>, vector<16x128xf32>
    %c0_i32_17 = arith.constant 0 : i32
    %c16_i32 = arith.constant 16 : i32
    %17 = arith.muli %c0_i32_17, %c16_i32 : i32
    %18 = tpu.assume_multiple %17, 16 : i32
    %19 = arith.index_cast %18 : i32 to index
    %c0_18 = arith.constant 0 : index
    %20 = vector.load %arg10[%19, %c0_18] : memref<128x384xf32, #tpu.memory_space<vmem>>, vector<16x384xf32>
    %21 = arith.truncf %15 : vector<16x128xf32> to vector<16x128xbf16>
    %cst_19 = arith.constant dense<0.000000e+00> : vector<16x384xf32>
    %22 = tpu.matmul %21, %11, %cst_19 {dimension_numbers = #tpu.dot_dimension_numbers<[1], [0], [0], [1], [0, 0, 1, 1], [], []>} : vector<16x128xbf16>, vector<128x384xbf16>, vector<16x384xf32> -> vector<16x384xf32>
    %23 = arith.addf %22, %14 : vector<16x384xf32>
    %24 = vector.extract_strided_slice %20 {offsets = [0, 0], sizes = [16, 128], strides = [1, 1]} : vector<16x384xf32> to vector<16x128xf32>
    %25 = vector.extract_strided_slice %20 {offsets = [0, 128], sizes = [16, 128], strides = [1, 1]} : vector<16x384xf32> to vector<16x128xf32>
    %26 = vector.extract_strided_slice %20 {offsets = [0, 256], sizes = [16, 128], strides = [1, 1]} : vector<16x384xf32> to vector<16x128xf32>
    %27 = vector.extract_strided_slice %23 {offsets = [0, 0], sizes = [16, 128], strides = [1, 1]} : vector<16x384xf32> to vector<16x128xf32>
    %28 = vector.extract_strided_slice %23 {offsets = [0, 128], sizes = [16, 128], strides = [1, 1]} : vector<16x384xf32> to vector<16x128xf32>
    %29 = vector.extract_strided_slice %23 {offsets = [0, 256], sizes = [16, 128], strides = [1, 1]} : vector<16x384xf32> to vector<16x128xf32>
    %30 = arith.addf %24, %27 : vector<16x128xf32>
    %31 = arith.negf %30 : vector<16x128xf32>
    %32 = math.exp %31 : vector<16x128xf32>
    %cst_20 = arith.constant 1.000000e+00 : f32
    %33 = vector.broadcast %cst_20 : f32 to vector<16x128xf32>
    %34 = arith.addf %33, %32 : vector<16x128xf32>
    %35 = arith.divf %33, %34 : vector<16x128xf32>
    %36 = arith.addf %25, %28 : vector<16x128xf32>
    %37 = arith.negf %36 : vector<16x128xf32>
    %38 = math.exp %37 : vector<16x128xf32>
    %cst_21 = arith.constant 1.000000e+00 : f32
    %39 = vector.broadcast %cst_21 : f32 to vector<16x128xf32>
    %40 = arith.addf %39, %38 : vector<16x128xf32>
    %41 = arith.divf %39, %40 : vector<16x128xf32>
    %42 = arith.mulf %35, %29 : vector<16x128xf32>
    %43 = arith.addf %26, %42 : vector<16x128xf32>
    %44 = math.tanh %43 : vector<16x128xf32>
    %45 = arith.subf %15, %44 : vector<16x128xf32>
    %46 = arith.mulf %41, %45 : vector<16x128xf32>
    %47 = arith.addf %44, %46 : vector<16x128xf32>
    %c8_i32 = arith.constant 8 : i32
    %48 = arith.muli %arg1, %c8_i32 : i32
    %49 = arith.addi %48, %c0_i32_17 : i32
    %c8_i32_22 = arith.constant 8 : i32
    %50 = arith.cmpi slt, %49, %c8_i32_22 : i32
    %51 = arith.select %50, %47, %15 : vector<16x128xf32>
    %52 = arith.maximumf %16, %51 : vector<16x128xf32>
    %53 = arith.select %50, %52, %16 : vector<16x128xf32>
    %c1_i32 = arith.constant 1 : i32
    %c16_i32_23 = arith.constant 16 : i32
    %54 = arith.muli %c1_i32, %c16_i32_23 : i32
    %55 = tpu.assume_multiple %54, 16 : i32
    %56 = arith.index_cast %55 : i32 to index
    %c0_24 = arith.constant 0 : index
    %57 = vector.load %arg10[%56, %c0_24] : memref<128x384xf32, #tpu.memory_space<vmem>>, vector<16x384xf32>
    %58 = arith.truncf %51 : vector<16x128xf32> to vector<16x128xbf16>
    %cst_25 = arith.constant dense<0.000000e+00> : vector<16x384xf32>
    %59 = tpu.matmul %58, %11, %cst_25 {dimension_numbers = #tpu.dot_dimension_numbers<[1], [0], [0], [1], [0, 0, 1, 1], [], []>} : vector<16x128xbf16>, vector<128x384xbf16>, vector<16x384xf32> -> vector<16x384xf32>
    %60 = arith.addf %59, %14 : vector<16x384xf32>
    %61 = vector.extract_strided_slice %57 {offsets = [0, 0], sizes = [16, 128], strides = [1, 1]} : vector<16x384xf32> to vector<16x128xf32>
    %62 = vector.extract_strided_slice %57 {offsets = [0, 128], sizes = [16, 128], strides = [1, 1]} : vector<16x384xf32> to vector<16x128xf32>
    %63 = vector.extract_strided_slice %57 {offsets = [0, 256], sizes = [16, 128], strides = [1, 1]} : vector<16x384xf32> to vector<16x128xf32>
    %64 = vector.extract_strided_slice %60 {offsets = [0, 0], sizes = [16, 128], strides = [1, 1]} : vector<16x384xf32> to vector<16x128xf32>
    %65 = vector.extract_strided_slice %60 {offsets = [0, 128], sizes = [16, 128], strides = [1, 1]} : vector<16x384xf32> to vector<16x128xf32>
    %66 = vector.extract_strided_slice %60 {offsets = [0, 256], sizes = [16, 128], strides = [1, 1]} : vector<16x384xf32> to vector<16x128xf32>
    %67 = arith.addf %61, %64 : vector<16x128xf32>
    %68 = arith.negf %67 : vector<16x128xf32>
    %69 = math.exp %68 : vector<16x128xf32>
    %cst_26 = arith.constant 1.000000e+00 : f32
    %70 = vector.broadcast %cst_26 : f32 to vector<16x128xf32>
    %71 = arith.addf %70, %69 : vector<16x128xf32>
    %72 = arith.divf %70, %71 : vector<16x128xf32>
    %73 = arith.addf %62, %65 : vector<16x128xf32>
    %74 = arith.negf %73 : vector<16x128xf32>
    %75 = math.exp %74 : vector<16x128xf32>
    %cst_27 = arith.constant 1.000000e+00 : f32
    %76 = vector.broadcast %cst_27 : f32 to vector<16x128xf32>
    %77 = arith.addf %76, %75 : vector<16x128xf32>
    %78 = arith.divf %76, %77 : vector<16x128xf32>
    %79 = arith.mulf %72, %66 : vector<16x128xf32>
    %80 = arith.addf %63, %79 : vector<16x128xf32>
    %81 = math.tanh %80 : vector<16x128xf32>
    %82 = arith.subf %51, %81 : vector<16x128xf32>
    %83 = arith.mulf %78, %82 : vector<16x128xf32>
    %84 = arith.addf %81, %83 : vector<16x128xf32>
    %c8_i32_28 = arith.constant 8 : i32
    %85 = arith.muli %arg1, %c8_i32_28 : i32
    %86 = arith.addi %85, %c1_i32 : i32
    %c8_i32_29 = arith.constant 8 : i32
    %87 = arith.cmpi slt, %86, %c8_i32_29 : i32
    %88 = arith.select %87, %84, %51 : vector<16x128xf32>
    %89 = arith.maximumf %53, %88 : vector<16x128xf32>
    %90 = arith.select %87, %89, %53 : vector<16x128xf32>
    %c2_i32 = arith.constant 2 : i32
    %c16_i32_30 = arith.constant 16 : i32
    %91 = arith.muli %c2_i32, %c16_i32_30 : i32
    %92 = tpu.assume_multiple %91, 16 : i32
    %93 = arith.index_cast %92 : i32 to index
    %c0_31 = arith.constant 0 : index
    %94 = vector.load %arg10[%93, %c0_31] : memref<128x384xf32, #tpu.memory_space<vmem>>, vector<16x384xf32>
    %95 = arith.truncf %88 : vector<16x128xf32> to vector<16x128xbf16>
    %cst_32 = arith.constant dense<0.000000e+00> : vector<16x384xf32>
    %96 = tpu.matmul %95, %11, %cst_32 {dimension_numbers = #tpu.dot_dimension_numbers<[1], [0], [0], [1], [0, 0, 1, 1], [], []>} : vector<16x128xbf16>, vector<128x384xbf16>, vector<16x384xf32> -> vector<16x384xf32>
    %97 = arith.addf %96, %14 : vector<16x384xf32>
    %98 = vector.extract_strided_slice %94 {offsets = [0, 0], sizes = [16, 128], strides = [1, 1]} : vector<16x384xf32> to vector<16x128xf32>
    %99 = vector.extract_strided_slice %94 {offsets = [0, 128], sizes = [16, 128], strides = [1, 1]} : vector<16x384xf32> to vector<16x128xf32>
    %100 = vector.extract_strided_slice %94 {offsets = [0, 256], sizes = [16, 128], strides = [1, 1]} : vector<16x384xf32> to vector<16x128xf32>
    %101 = vector.extract_strided_slice %97 {offsets = [0, 0], sizes = [16, 128], strides = [1, 1]} : vector<16x384xf32> to vector<16x128xf32>
    %102 = vector.extract_strided_slice %97 {offsets = [0, 128], sizes = [16, 128], strides = [1, 1]} : vector<16x384xf32> to vector<16x128xf32>
    %103 = vector.extract_strided_slice %97 {offsets = [0, 256], sizes = [16, 128], strides = [1, 1]} : vector<16x384xf32> to vector<16x128xf32>
    %104 = arith.addf %98, %101 : vector<16x128xf32>
    %105 = arith.negf %104 : vector<16x128xf32>
    %106 = math.exp %105 : vector<16x128xf32>
    %cst_33 = arith.constant 1.000000e+00 : f32
    %107 = vector.broadcast %cst_33 : f32 to vector<16x128xf32>
    %108 = arith.addf %107, %106 : vector<16x128xf32>
    %109 = arith.divf %107, %108 : vector<16x128xf32>
    %110 = arith.addf %99, %102 : vector<16x128xf32>
    %111 = arith.negf %110 : vector<16x128xf32>
    %112 = math.exp %111 : vector<16x128xf32>
    %cst_34 = arith.constant 1.000000e+00 : f32
    %113 = vector.broadcast %cst_34 : f32 to vector<16x128xf32>
    %114 = arith.addf %113, %112 : vector<16x128xf32>
    %115 = arith.divf %113, %114 : vector<16x128xf32>
    %116 = arith.mulf %109, %103 : vector<16x128xf32>
    %117 = arith.addf %100, %116 : vector<16x128xf32>
    %118 = math.tanh %117 : vector<16x128xf32>
    %119 = arith.subf %88, %118 : vector<16x128xf32>
    %120 = arith.mulf %115, %119 : vector<16x128xf32>
    %121 = arith.addf %118, %120 : vector<16x128xf32>
    %c8_i32_35 = arith.constant 8 : i32
    %122 = arith.muli %arg1, %c8_i32_35 : i32
    %123 = arith.addi %122, %c2_i32 : i32
    %c8_i32_36 = arith.constant 8 : i32
    %124 = arith.cmpi slt, %123, %c8_i32_36 : i32
    %125 = arith.select %124, %121, %88 : vector<16x128xf32>
    %126 = arith.maximumf %90, %125 : vector<16x128xf32>
    %127 = arith.select %124, %126, %90 : vector<16x128xf32>
    %c3_i32 = arith.constant 3 : i32
    %c16_i32_37 = arith.constant 16 : i32
    %128 = arith.muli %c3_i32, %c16_i32_37 : i32
    %129 = tpu.assume_multiple %128, 16 : i32
    %130 = arith.index_cast %129 : i32 to index
    %c0_38 = arith.constant 0 : index
    %131 = vector.load %arg10[%130, %c0_38] : memref<128x384xf32, #tpu.memory_space<vmem>>, vector<16x384xf32>
    %132 = arith.truncf %125 : vector<16x128xf32> to vector<16x128xbf16>
    %cst_39 = arith.constant dense<0.000000e+00> : vector<16x384xf32>
    %133 = tpu.matmul %132, %11, %cst_39 {dimension_numbers = #tpu.dot_dimension_numbers<[1], [0], [0], [1], [0, 0, 1, 1], [], []>} : vector<16x128xbf16>, vector<128x384xbf16>, vector<16x384xf32> -> vector<16x384xf32>
    %134 = arith.addf %133, %14 : vector<16x384xf32>
    %135 = vector.extract_strided_slice %131 {offsets = [0, 0], sizes = [16, 128], strides = [1, 1]} : vector<16x384xf32> to vector<16x128xf32>
    %136 = vector.extract_strided_slice %131 {offsets = [0, 128], sizes = [16, 128], strides = [1, 1]} : vector<16x384xf32> to vector<16x128xf32>
    %137 = vector.extract_strided_slice %131 {offsets = [0, 256], sizes = [16, 128], strides = [1, 1]} : vector<16x384xf32> to vector<16x128xf32>
    %138 = vector.extract_strided_slice %134 {offsets = [0, 0], sizes = [16, 128], strides = [1, 1]} : vector<16x384xf32> to vector<16x128xf32>
    %139 = vector.extract_strided_slice %134 {offsets = [0, 128], sizes = [16, 128], strides = [1, 1]} : vector<16x384xf32> to vector<16x128xf32>
    %140 = vector.extract_strided_slice %134 {offsets = [0, 256], sizes = [16, 128], strides = [1, 1]} : vector<16x384xf32> to vector<16x128xf32>
    %141 = arith.addf %135, %138 : vector<16x128xf32>
    %142 = arith.negf %141 : vector<16x128xf32>
    %143 = math.exp %142 : vector<16x128xf32>
    %cst_40 = arith.constant 1.000000e+00 : f32
    %144 = vector.broadcast %cst_40 : f32 to vector<16x128xf32>
    %145 = arith.addf %144, %143 : vector<16x128xf32>
    %146 = arith.divf %144, %145 : vector<16x128xf32>
    %147 = arith.addf %136, %139 : vector<16x128xf32>
    %148 = arith.negf %147 : vector<16x128xf32>
    %149 = math.exp %148 : vector<16x128xf32>
    %cst_41 = arith.constant 1.000000e+00 : f32
    %150 = vector.broadcast %cst_41 : f32 to vector<16x128xf32>
    %151 = arith.addf %150, %149 : vector<16x128xf32>
    %152 = arith.divf %150, %151 : vector<16x128xf32>
    %153 = arith.mulf %146, %140 : vector<16x128xf32>
    %154 = arith.addf %137, %153 : vector<16x128xf32>
    %155 = math.tanh %154 : vector<16x128xf32>
    %156 = arith.subf %125, %155 : vector<16x128xf32>
    %157 = arith.mulf %152, %156 : vector<16x128xf32>
    %158 = arith.addf %155, %157 : vector<16x128xf32>
    %c8_i32_42 = arith.constant 8 : i32
    %159 = arith.muli %arg1, %c8_i32_42 : i32
    %160 = arith.addi %159, %c3_i32 : i32
    %c8_i32_43 = arith.constant 8 : i32
    %161 = arith.cmpi slt, %160, %c8_i32_43 : i32
    %162 = arith.select %161, %158, %125 : vector<16x128xf32>
    %163 = arith.maximumf %127, %162 : vector<16x128xf32>
    %164 = arith.select %161, %163, %127 : vector<16x128xf32>
    %c4_i32 = arith.constant 4 : i32
    %c16_i32_44 = arith.constant 16 : i32
    %165 = arith.muli %c4_i32, %c16_i32_44 : i32
    %166 = tpu.assume_multiple %165, 16 : i32
    %167 = arith.index_cast %166 : i32 to index
    %c0_45 = arith.constant 0 : index
    %168 = vector.load %arg10[%167, %c0_45] : memref<128x384xf32, #tpu.memory_space<vmem>>, vector<16x384xf32>
    %169 = arith.truncf %162 : vector<16x128xf32> to vector<16x128xbf16>
    %cst_46 = arith.constant dense<0.000000e+00> : vector<16x384xf32>
    %170 = tpu.matmul %169, %11, %cst_46 {dimension_numbers = #tpu.dot_dimension_numbers<[1], [0], [0], [1], [0, 0, 1, 1], [], []>} : vector<16x128xbf16>, vector<128x384xbf16>, vector<16x384xf32> -> vector<16x384xf32>
    %171 = arith.addf %170, %14 : vector<16x384xf32>
    %172 = vector.extract_strided_slice %168 {offsets = [0, 0], sizes = [16, 128], strides = [1, 1]} : vector<16x384xf32> to vector<16x128xf32>
    %173 = vector.extract_strided_slice %168 {offsets = [0, 128], sizes = [16, 128], strides = [1, 1]} : vector<16x384xf32> to vector<16x128xf32>
    %174 = vector.extract_strided_slice %168 {offsets = [0, 256], sizes = [16, 128], strides = [1, 1]} : vector<16x384xf32> to vector<16x128xf32>
    %175 = vector.extract_strided_slice %171 {offsets = [0, 0], sizes = [16, 128], strides = [1, 1]} : vector<16x384xf32> to vector<16x128xf32>
    %176 = vector.extract_strided_slice %171 {offsets = [0, 128], sizes = [16, 128], strides = [1, 1]} : vector<16x384xf32> to vector<16x128xf32>
    %177 = vector.extract_strided_slice %171 {offsets = [0, 256], sizes = [16, 128], strides = [1, 1]} : vector<16x384xf32> to vector<16x128xf32>
    %178 = arith.addf %172, %175 : vector<16x128xf32>
    %179 = arith.negf %178 : vector<16x128xf32>
    %180 = math.exp %179 : vector<16x128xf32>
    %cst_47 = arith.constant 1.000000e+00 : f32
    %181 = vector.broadcast %cst_47 : f32 to vector<16x128xf32>
    %182 = arith.addf %181, %180 : vector<16x128xf32>
    %183 = arith.divf %181, %182 : vector<16x128xf32>
    %184 = arith.addf %173, %176 : vector<16x128xf32>
    %185 = arith.negf %184 : vector<16x128xf32>
    %186 = math.exp %185 : vector<16x128xf32>
    %cst_48 = arith.constant 1.000000e+00 : f32
    %187 = vector.broadcast %cst_48 : f32 to vector<16x128xf32>
    %188 = arith.addf %187, %186 : vector<16x128xf32>
    %189 = arith.divf %187, %188 : vector<16x128xf32>
    %190 = arith.mulf %183, %177 : vector<16x128xf32>
    %191 = arith.addf %174, %190 : vector<16x128xf32>
    %192 = math.tanh %191 : vector<16x128xf32>
    %193 = arith.subf %162, %192 : vector<16x128xf32>
    %194 = arith.mulf %189, %193 : vector<16x128xf32>
    %195 = arith.addf %192, %194 : vector<16x128xf32>
    %c8_i32_49 = arith.constant 8 : i32
    %196 = arith.muli %arg1, %c8_i32_49 : i32
    %197 = arith.addi %196, %c4_i32 : i32
    %c8_i32_50 = arith.constant 8 : i32
    %198 = arith.cmpi slt, %197, %c8_i32_50 : i32
    %199 = arith.select %198, %195, %162 : vector<16x128xf32>
    %200 = arith.maximumf %164, %199 : vector<16x128xf32>
    %201 = arith.select %198, %200, %164 : vector<16x128xf32>
    %c5_i32 = arith.constant 5 : i32
    %c16_i32_51 = arith.constant 16 : i32
    %202 = arith.muli %c5_i32, %c16_i32_51 : i32
    %203 = tpu.assume_multiple %202, 16 : i32
    %204 = arith.index_cast %203 : i32 to index
    %c0_52 = arith.constant 0 : index
    %205 = vector.load %arg10[%204, %c0_52] : memref<128x384xf32, #tpu.memory_space<vmem>>, vector<16x384xf32>
    %206 = arith.truncf %199 : vector<16x128xf32> to vector<16x128xbf16>
    %cst_53 = arith.constant dense<0.000000e+00> : vector<16x384xf32>
    %207 = tpu.matmul %206, %11, %cst_53 {dimension_numbers = #tpu.dot_dimension_numbers<[1], [0], [0], [1], [0, 0, 1, 1], [], []>} : vector<16x128xbf16>, vector<128x384xbf16>, vector<16x384xf32> -> vector<16x384xf32>
    %208 = arith.addf %207, %14 : vector<16x384xf32>
    %209 = vector.extract_strided_slice %205 {offsets = [0, 0], sizes = [16, 128], strides = [1, 1]} : vector<16x384xf32> to vector<16x128xf32>
    %210 = vector.extract_strided_slice %205 {offsets = [0, 128], sizes = [16, 128], strides = [1, 1]} : vector<16x384xf32> to vector<16x128xf32>
    %211 = vector.extract_strided_slice %205 {offsets = [0, 256], sizes = [16, 128], strides = [1, 1]} : vector<16x384xf32> to vector<16x128xf32>
    %212 = vector.extract_strided_slice %208 {offsets = [0, 0], sizes = [16, 128], strides = [1, 1]} : vector<16x384xf32> to vector<16x128xf32>
    %213 = vector.extract_strided_slice %208 {offsets = [0, 128], sizes = [16, 128], strides = [1, 1]} : vector<16x384xf32> to vector<16x128xf32>
    %214 = vector.extract_strided_slice %208 {offsets = [0, 256], sizes = [16, 128], strides = [1, 1]} : vector<16x384xf32> to vector<16x128xf32>
    %215 = arith.addf %209, %212 : vector<16x128xf32>
    %216 = arith.negf %215 : vector<16x128xf32>
    %217 = math.exp %216 : vector<16x128xf32>
    %cst_54 = arith.constant 1.000000e+00 : f32
    %218 = vector.broadcast %cst_54 : f32 to vector<16x128xf32>
    %219 = arith.addf %218, %217 : vector<16x128xf32>
    %220 = arith.divf %218, %219 : vector<16x128xf32>
    %221 = arith.addf %210, %213 : vector<16x128xf32>
    %222 = arith.negf %221 : vector<16x128xf32>
    %223 = math.exp %222 : vector<16x128xf32>
    %cst_55 = arith.constant 1.000000e+00 : f32
    %224 = vector.broadcast %cst_55 : f32 to vector<16x128xf32>
    %225 = arith.addf %224, %223 : vector<16x128xf32>
    %226 = arith.divf %224, %225 : vector<16x128xf32>
    %227 = arith.mulf %220, %214 : vector<16x128xf32>
    %228 = arith.addf %211, %227 : vector<16x128xf32>
    %229 = math.tanh %228 : vector<16x128xf32>
    %230 = arith.subf %199, %229 : vector<16x128xf32>
    %231 = arith.mulf %226, %230 : vector<16x128xf32>
    %232 = arith.addf %229, %231 : vector<16x128xf32>
    %c8_i32_56 = arith.constant 8 : i32
    %233 = arith.muli %arg1, %c8_i32_56 : i32
    %234 = arith.addi %233, %c5_i32 : i32
    %c8_i32_57 = arith.constant 8 : i32
    %235 = arith.cmpi slt, %234, %c8_i32_57 : i32
    %236 = arith.select %235, %232, %199 : vector<16x128xf32>
    %237 = arith.maximumf %201, %236 : vector<16x128xf32>
    %238 = arith.select %235, %237, %201 : vector<16x128xf32>
    %c6_i32 = arith.constant 6 : i32
    %c16_i32_58 = arith.constant 16 : i32
    %239 = arith.muli %c6_i32, %c16_i32_58 : i32
    %240 = tpu.assume_multiple %239, 16 : i32
    %241 = arith.index_cast %240 : i32 to index
    %c0_59 = arith.constant 0 : index
    %242 = vector.load %arg10[%241, %c0_59] : memref<128x384xf32, #tpu.memory_space<vmem>>, vector<16x384xf32>
    %243 = arith.truncf %236 : vector<16x128xf32> to vector<16x128xbf16>
    %cst_60 = arith.constant dense<0.000000e+00> : vector<16x384xf32>
    %244 = tpu.matmul %243, %11, %cst_60 {dimension_numbers = #tpu.dot_dimension_numbers<[1], [0], [0], [1], [0, 0, 1, 1], [], []>} : vector<16x128xbf16>, vector<128x384xbf16>, vector<16x384xf32> -> vector<16x384xf32>
    %245 = arith.addf %244, %14 : vector<16x384xf32>
    %246 = vector.extract_strided_slice %242 {offsets = [0, 0], sizes = [16, 128], strides = [1, 1]} : vector<16x384xf32> to vector<16x128xf32>
    %247 = vector.extract_strided_slice %242 {offsets = [0, 128], sizes = [16, 128], strides = [1, 1]} : vector<16x384xf32> to vector<16x128xf32>
    %248 = vector.extract_strided_slice %242 {offsets = [0, 256], sizes = [16, 128], strides = [1, 1]} : vector<16x384xf32> to vector<16x128xf32>
    %249 = vector.extract_strided_slice %245 {offsets = [0, 0], sizes = [16, 128], strides = [1, 1]} : vector<16x384xf32> to vector<16x128xf32>
    %250 = vector.extract_strided_slice %245 {offsets = [0, 128], sizes = [16, 128], strides = [1, 1]} : vector<16x384xf32> to vector<16x128xf32>
    %251 = vector.extract_strided_slice %245 {offsets = [0, 256], sizes = [16, 128], strides = [1, 1]} : vector<16x384xf32> to vector<16x128xf32>
    %252 = arith.addf %246, %249 : vector<16x128xf32>
    %253 = arith.negf %252 : vector<16x128xf32>
    %254 = math.exp %253 : vector<16x128xf32>
    %cst_61 = arith.constant 1.000000e+00 : f32
    %255 = vector.broadcast %cst_61 : f32 to vector<16x128xf32>
    %256 = arith.addf %255, %254 : vector<16x128xf32>
    %257 = arith.divf %255, %256 : vector<16x128xf32>
    %258 = arith.addf %247, %250 : vector<16x128xf32>
    %259 = arith.negf %258 : vector<16x128xf32>
    %260 = math.exp %259 : vector<16x128xf32>
    %cst_62 = arith.constant 1.000000e+00 : f32
    %261 = vector.broadcast %cst_62 : f32 to vector<16x128xf32>
    %262 = arith.addf %261, %260 : vector<16x128xf32>
    %263 = arith.divf %261, %262 : vector<16x128xf32>
    %264 = arith.mulf %257, %251 : vector<16x128xf32>
    %265 = arith.addf %248, %264 : vector<16x128xf32>
    %266 = math.tanh %265 : vector<16x128xf32>
    %267 = arith.subf %236, %266 : vector<16x128xf32>
    %268 = arith.mulf %263, %267 : vector<16x128xf32>
    %269 = arith.addf %266, %268 : vector<16x128xf32>
    %c8_i32_63 = arith.constant 8 : i32
    %270 = arith.muli %arg1, %c8_i32_63 : i32
    %271 = arith.addi %270, %c6_i32 : i32
    %c8_i32_64 = arith.constant 8 : i32
    %272 = arith.cmpi slt, %271, %c8_i32_64 : i32
    %273 = arith.select %272, %269, %236 : vector<16x128xf32>
    %274 = arith.maximumf %238, %273 : vector<16x128xf32>
    %275 = arith.select %272, %274, %238 : vector<16x128xf32>
    %c7_i32 = arith.constant 7 : i32
    %c16_i32_65 = arith.constant 16 : i32
    %276 = arith.muli %c7_i32, %c16_i32_65 : i32
    %277 = tpu.assume_multiple %276, 16 : i32
    %278 = arith.index_cast %277 : i32 to index
    %c0_66 = arith.constant 0 : index
    %279 = vector.load %arg10[%278, %c0_66] : memref<128x384xf32, #tpu.memory_space<vmem>>, vector<16x384xf32>
    %280 = arith.truncf %273 : vector<16x128xf32> to vector<16x128xbf16>
    %cst_67 = arith.constant dense<0.000000e+00> : vector<16x384xf32>
    %281 = tpu.matmul %280, %11, %cst_67 {dimension_numbers = #tpu.dot_dimension_numbers<[1], [0], [0], [1], [0, 0, 1, 1], [], []>} : vector<16x128xbf16>, vector<128x384xbf16>, vector<16x384xf32> -> vector<16x384xf32>
    %282 = arith.addf %281, %14 : vector<16x384xf32>
    %283 = vector.extract_strided_slice %279 {offsets = [0, 0], sizes = [16, 128], strides = [1, 1]} : vector<16x384xf32> to vector<16x128xf32>
    %284 = vector.extract_strided_slice %279 {offsets = [0, 128], sizes = [16, 128], strides = [1, 1]} : vector<16x384xf32> to vector<16x128xf32>
    %285 = vector.extract_strided_slice %279 {offsets = [0, 256], sizes = [16, 128], strides = [1, 1]} : vector<16x384xf32> to vector<16x128xf32>
    %286 = vector.extract_strided_slice %282 {offsets = [0, 0], sizes = [16, 128], strides = [1, 1]} : vector<16x384xf32> to vector<16x128xf32>
    %287 = vector.extract_strided_slice %282 {offsets = [0, 128], sizes = [16, 128], strides = [1, 1]} : vector<16x384xf32> to vector<16x128xf32>
    %288 = vector.extract_strided_slice %282 {offsets = [0, 256], sizes = [16, 128], strides = [1, 1]} : vector<16x384xf32> to vector<16x128xf32>
    %289 = arith.addf %283, %286 : vector<16x128xf32>
    %290 = arith.negf %289 : vector<16x128xf32>
    %291 = math.exp %290 : vector<16x128xf32>
    %cst_68 = arith.constant 1.000000e+00 : f32
    %292 = vector.broadcast %cst_68 : f32 to vector<16x128xf32>
    %293 = arith.addf %292, %291 : vector<16x128xf32>
    %294 = arith.divf %292, %293 : vector<16x128xf32>
    %295 = arith.addf %284, %287 : vector<16x128xf32>
    %296 = arith.negf %295 : vector<16x128xf32>
    %297 = math.exp %296 : vector<16x128xf32>
    %cst_69 = arith.constant 1.000000e+00 : f32
    %298 = vector.broadcast %cst_69 : f32 to vector<16x128xf32>
    %299 = arith.addf %298, %297 : vector<16x128xf32>
    %300 = arith.divf %298, %299 : vector<16x128xf32>
    %301 = arith.mulf %294, %288 : vector<16x128xf32>
    %302 = arith.addf %285, %301 : vector<16x128xf32>
    %303 = math.tanh %302 : vector<16x128xf32>
    %304 = arith.subf %273, %303 : vector<16x128xf32>
    %305 = arith.mulf %300, %304 : vector<16x128xf32>
    %306 = arith.addf %303, %305 : vector<16x128xf32>
    %c8_i32_70 = arith.constant 8 : i32
    %307 = arith.muli %arg1, %c8_i32_70 : i32
    %308 = arith.addi %307, %c7_i32 : i32
    %c8_i32_71 = arith.constant 8 : i32
    %309 = arith.cmpi slt, %308, %c8_i32_71 : i32
    %310 = arith.select %309, %306, %273 : vector<16x128xf32>
    %311 = arith.maximumf %275, %310 : vector<16x128xf32>
    %312 = arith.select %309, %311, %275 : vector<16x128xf32>
    %c8_i32_72 = arith.constant 8 : i32
    %c0_73 = arith.constant 0 : index
    %c0_74 = arith.constant 0 : index
    %313 = vector.load %arg11[%c0_73, %c0_74] : memref<16x128xf32, #tpu.memory_space<vmem>>, vector<16x128xf32>
    tpu.vector_store %arg11[%c0_73, %c0_74], %310 {strides = array<i32>} : memref<16x128xf32, #tpu.memory_space<vmem>>, vector<16x128xf32>,
    %c0_75 = arith.constant 0 : index
    %c0_76 = arith.constant 0 : index
    %314 = vector.load %arg12[%c0_75, %c0_76] : memref<16x128xf32, #tpu.memory_space<vmem>>, vector<16x128xf32>
    tpu.vector_store %arg12[%c0_75, %c0_76], %312 {strides = array<i32>} : memref<16x128xf32, #tpu.memory_space<vmem>>, vector<16x128xf32>,
    %c0_i32_77 = arith.constant 0 : i32
    %315 = arith.cmpi eq, %arg1, %c0_i32_77 : i32
    %316 = arith.extui %315 : i1 to i32
    %c0_i32_78 = arith.constant 0 : i32
    %317 = arith.cmpi ne, %316, %c0_i32_78 : i32
    scf.if %317 {
      %c0_79 = arith.constant 0 : index
      %c0_80 = arith.constant 0 : index
      %318 = vector.load %arg12[%c0_79, %c0_80] : memref<16x128xf32, #tpu.memory_space<vmem>>, vector<16x128xf32>
      %319 = math.tanh %318 : vector<16x128xf32>
      %320 = arith.truncf %319 : vector<16x128xf32> to vector<16x128xbf16>
      %c0_81 = arith.constant 0 : index
      %c0_82 = arith.constant 0 : index
      %321 = vector.load %arg7[%c0_81, %c0_82] : memref<128x128xbf16, #tpu.memory_space<vmem>>, vector<128x128xbf16>
      %cst_83 = arith.constant dense<0.000000e+00> : vector<16x128xf32>
      %322 = tpu.matmul %320, %321, %cst_83 {dimension_numbers = #tpu.dot_dimension_numbers<[1], [0], [0], [1], [0, 0, 1, 1], [], []>} : vector<16x128xbf16>, vector<128x128xbf16>, vector<16x128xf32> -> vector<16x128xf32>
      %c0_84 = arith.constant 0 : index
      %c0_85 = arith.constant 0 : index
      %323 = vector.load %arg8[%c0_84, %c0_85] : memref<1x128xf32, #tpu.memory_space<vmem>>, vector<1x128xf32>
      %324 = vector.broadcast %323 : vector<1x128xf32> to vector<16x128xf32>
      %325 = arith.addf %322, %324 : vector<16x128xf32>
      %c0_86 = arith.constant 0 : index
      %c0_87 = arith.constant 0 : index
      %326 = vector.load %arg9[%c0_86, %c0_87] : memref<16x128xf32, #tpu.memory_space<vmem>>, vector<16x128xf32>
      tpu.vector_store %arg9[%c0_86, %c0_87], %325 {strides = array<i32>} : memref<16x128xf32, #tpu.memory_space<vmem>>, vector<16x128xf32>,
    } else {
    }
    return
  }
  func.func @transform_0(%arg0: i32, %arg1: i32) -> (i32, i32, i32) {
    %c0_i32 = arith.constant 0 : i32
    %c0_i32_0 = arith.constant 0 : i32
    return %arg1, %arg0, %c0_i32 : i32, i32, i32
  }
  func.func @transform_1(%arg0: i32, %arg1: i32) -> (i32, i32) {
    %c0_i32 = arith.constant 0 : i32
    %c0_i32_0 = arith.constant 0 : i32
    %c0_i32_1 = arith.constant 0 : i32
    return %c0_i32, %c0_i32_0 : i32, i32
  }
  func.func @transform_2(%arg0: i32, %arg1: i32) -> (i32, i32) {
    %c0_i32 = arith.constant 0 : i32
    %c0_i32_0 = arith.constant 0 : i32
    %c0_i32_1 = arith.constant 0 : i32
    return %c0_i32, %c0_i32_0 : i32, i32
  }
  func.func @transform_3(%arg0: i32, %arg1: i32) -> (i32, i32) {
    %c0_i32 = arith.constant 0 : i32
    %c0_i32_0 = arith.constant 0 : i32
    %c0_i32_1 = arith.constant 0 : i32
    return %c0_i32, %c0_i32_0 : i32, i32
  }
  func.func @transform_4(%arg0: i32, %arg1: i32) -> (i32, i32) {
    %c0_i32 = arith.constant 0 : i32
    %c0_i32_0 = arith.constant 0 : i32
    %c0_i32_1 = arith.constant 0 : i32
    return %c0_i32, %c0_i32_0 : i32, i32
  }
  func.func @transform_5(%arg0: i32, %arg1: i32) -> (i32, i32) {
    %c0_i32 = arith.constant 0 : i32
    %c0_i32_0 = arith.constant 0 : i32
    %c0_i32_1 = arith.constant 0 : i32
    return %c0_i32, %c0_i32_0 : i32, i32
  }
  func.func @transform_6(%arg0: i32, %arg1: i32) -> (i32, i32) {
    %c0_i32 = arith.constant 0 : i32
    %c0_i32_0 = arith.constant 0 : i32
    %c0_i32_1 = arith.constant 0 : i32
    return %c0_i32, %c0_i32_0 : i32, i32
  }
  func.func @transform_7(%arg0: i32, %arg1: i32) -> (i32, i32) {
    %c0_i32 = arith.constant 0 : i32
    %c0_i32_0 = arith.constant 0 : i32
    return %arg0, %c0_i32 : i32, i32
  }
}

</mosaic_0001>

<bundles_post_ra>
// kernel: tpu_custom_call.1
= control target key start
LH: loop header
LB: loop body
LE: loop exit
PB: predicated region body
PF: predicated region fallthrough
CT: control target
= control target key end

     0   :  { %12 = vsyncpa [#allocation6], 0  ;;  %s3699_s0 = inlined_call_operand.hbm [shape: bf16[8,16,128], index: 0, kind: input, shape index: {}]   ;;  %s3700_s1 = inlined_call_operand.hbm [shape: bf16[128,384], index: 1, kind: input, shape index: {}]   ;;  %s3701_s2 = inlined_call_operand.hbm [shape: bf16[128,384], index: 2, kind: input, shape index: {}]   ;;  %s3702_s3 = inlined_call_operand.vmem [shape: f32[1,384], index: 3, kind: input, shape index: {}]   ;;  %s3703_s4 = inlined_call_operand.vmem [shape: f32[1,384], index: 4, kind: input, shape index: {}]   ;;  %s3704_s5 = inlined_call_operand.hbm [shape: bf16[128,128], index: 5, kind: input, shape index: {}]   ;;  %s3705_s6 = inlined_call_operand.vmem [shape: f32[1,128], index: 6, kind: input, shape index: {}]   ;;  %s3706_s7 = inlined_call_operand.hbm [shape: f32[16,128], index: 7, kind: output, shape index: {}]  }
   0x1   :  { %13 = vsyncpa [#allocation9], 0 }
   0x2   :  { %14 = vsyncpa [#allocation12], 0 }
   0x3   :  { %15 = vsyncpa [#allocation7], 0  ;;  %s2880_s24 = smov [#allocation8]  }
   0x4   :  { %s33_s25 = sshll.u32 %s2880_s24, 4  ;;  %s34_s25 = int_to_ptr.vmem [resolvable:$true] %s33_s25 }
   0x5   :  { %s2780_s26 = scalar_lea.vmem %s34_s25, 3072  ;;  %p2785_p1 = scmp.lt.s32.totalorder %s34_s25, %s34_s25 }
   0x6   :  { %p2781_p0 = scmp.ne.s32.totalorder %s34_s25, %s2780_s26  ;;  %p2786_p2 = scmp.lt.s32.totalorder %s2780_s26, %s2780_s26 }
   0x8   :  { %p2787_p3 = por %p2786_p2, %p2785_p1 }
   0xa   :  { %p2788_p4 = pnand %p2787_p3, %p2781_p0 }
   0xc   :  { %2791 = shalt.err (!%p2788_p4)
}
   0xd   :  { %s2881_s27 = smov 192   ;;  %s2882_s28 = smov 12  }
   0xe   :  { %39 = dma.hbm_to_vmem [thread:$0]  %s3700_s1, 3072, %s34_s25, [#allocation9], %s2881_s27, %s2881_s27, %s2882_s28  }
   0xf   :  { %s2883_s8 = smov [#allocation5]  }
  0x10   :  { %s21_s9 = sshll.u32 %s2883_s8, 4  ;;  %s22_s9 = int_to_ptr.vmem [resolvable:$true] %s21_s9 }
  0x11   :  { %s2800_s10 = scalar_lea.vmem %s22_s9, 1024  ;;  %p2805_p6 = scmp.lt.s32.totalorder %s22_s9, %s22_s9 }
  0x12   :  { %p2801_p5 = scmp.ne.s32.totalorder %s22_s9, %s2800_s10  ;;  %p2806_p7 = scmp.lt.s32.totalorder %s2800_s10, %s2800_s10 }
  0x14   :  { %p2807_p8 = por %p2806_p7, %p2805_p6 }
  0x16   :  { %p2808_p9 = pnand %p2807_p8, %p2801_p5 }
  0x18   :  { %2811 = shalt.err (!%p2808_p9)
}
  0x19   :  { %s2884_s11 = smov 64   ;;  %s2885_s12 = smov 4  }
  0x1a   :  { %27 = dma.hbm_to_vmem [thread:$0]  %s3699_s0, 1024, %s22_s9, [#allocation6], %s2884_s11, %s2884_s11, %s2885_s12  }
  0x1b   :  { %s2886_s15 = smov [#allocation10]   ;;  %s2887_s17 = smov [#allocation11]  }
  0x1c   :  { %s45_s16 = sshll.u32 %s2886_s15, 4  ;;  %s61_s1 = sshll.u32 %s2887_s17, 4  ;;  %s46_s16 = int_to_ptr.vmem [resolvable:$true] %s45_s16  ;;  %s62_s1 = int_to_ptr.vmem [resolvable:$true] %s61_s1 }
  0x1d   :  { %s2820_s18 = scalar_lea.vmem %s46_s16, 3072  ;;  %p2825_p11 = scmp.lt.s32.totalorder %s46_s16, %s46_s16 }
  0x1e   :  { %p2821_p10 = scmp.ne.s32.totalorder %s46_s16, %s2820_s18  ;;  %p2826_p12 = scmp.lt.s32.totalorder %s2820_s18, %s2820_s18 }
  0x20   :  { %p2827_p13 = por %p2826_p12, %p2825_p11 }
  0x22   :  { %p2828_p0 = pnand %p2827_p13, %p2821_p10 }
  0x24   :  { %2831 = shalt.err (!%p2828_p0)
}
  0x25   :  { %51 = dma.hbm_to_vmem [thread:$0]  %s3701_s2, 3072, %s46_s16, [#allocation9], %s2881_s27, %s2881_s27, %s2882_s28  }
  0x26   :  { %s2840_s0 = scalar_lea.vmem %s62_s1, 1024  ;;  %p2845_p2 = scmp.lt.s32.totalorder %s62_s1, %s62_s1 }
  0x27   :  { %p2841_p1 = scmp.ne.s32.totalorder %s62_s1, %s2840_s0  ;;  %p2846_p3 = scmp.lt.s32.totalorder %s2840_s0, %s2840_s0 }
  0x29   :  { %p2847_p4 = por %p2846_p3, %p2845_p2 }
  0x2b   :  { %p2848_p5 = pnand %p2847_p4, %p2841_p1 }
  0x2d   :  { %2851 = shalt.err (!%p2848_p5)
}
  0x2e   :  { %67 = dma.hbm_to_vmem [thread:$0]  %s3704_s5, 1024, %s62_s1, [#allocation12], %s2884_s11, %s2884_s11, %s2885_s12  }
  0x2f   :  { %2872 = dma.done.wait [#allocation6], 1024  }
  0x30   :  { %2873 = vsyncadd [#allocation6], 4294966272 }
  0x31   :  { %2874 = dma.done.wait [#allocation9], 6144  }
  0x32   :  { %2875 = vsyncadd [#allocation9], 4294961152 }
  0x33   :  { %2876 = dma.done.wait [#allocation12], 1024  }
  0x34   :  { %2877 = vsyncadd [#allocation12], 4294966272  ;;  %v3707_v0 = vmov 0   ;;  %v2504_v1 = vld [vmem:[#allocation8 + $0xac] ss:$12 sps:$4 sm:$0xff]   ;;  %v2536_v18 = vld [vmem:[#allocation5] sm:$0xff]   ;;  %v141_v59 = vlaneseq }
  0x35   :  { %364 = vmatprep.mubr.bf16.mxu0 %v3707_v0  ;;  %v2506_v2 = vld [vmem:[#allocation8 + $0xb0] ss:$12 sps:$4 sm:$0xff]   ;;  %332 = vmatprep.subr.bf16.mxu0 %v2504_v1  ;;  %v2507_v3 = vld [vmem:[#allocation8 + $0xa8] ss:$12 sps:$4 sm:$0xff]   ;;  %v2510_v5 = vld [vmem:[#allocation8 + $0x98] ss:$12 sps:$4 sm:$0xff]  }
  0x36   :  { %2277 = vmatprep.subr.bf16.mxu1 %v2506_v2  ;;  %v2508_v4 = vld [vmem:[#allocation8 + $0x94] ss:$12 sps:$4 sm:$0xff]   ;;  %333 = vmatpush1.bf16.msra.mxu0 %v2507_v3  ;;  %v2511_v6 = vld [vmem:[#allocation8 + $0x90] ss:$12 sps:$4 sm:$0xff]   ;;  %v2515_v9 = vld [vmem:[#allocation8 + $0x78] ss:$12 sps:$4 sm:$0xff]  }
  0x37   :  { %2278 = vmatpush3.bf16.msra.mxu1 %v2506_v2  ;;  %334 = vmatprep.subr.bf16.mxu0 %v2508_v4  ;;  %v2512_v7 = vld [vmem:[#allocation8 + $0x7c] ss:$12 sps:$4 sm:$0xff]   ;;  %v2514_v8 = vld [vmem:[#allocation8 + $0x80] ss:$12 sps:$4 sm:$0xff]   ;;  %v2516_v10 = vld [vmem:[#allocation8 + $0x64] ss:$12 sps:$4 sm:$0xff]  }
  0x38   :  { %2279 = vmatprep.subr.bf16.mxu1 %v2510_v5  ;;  %v2518_v11 = vld [vmem:[#allocation8 + $0x68] ss:$12 sps:$4 sm:$0xff]   ;;  %v2519_v12 = vld [vmem:[#allocation8 + $0x60] ss:$12 sps:$4 sm:$0xff]   ;;  %v2522_v14 = vld [vmem:[#allocation8 + $0x50] ss:$12 sps:$4 sm:$0xff]   ;;  %2293 = vmatprep.mubr.bf16.mxu1 %v2536_v18 }
  0x39   :  { %v2520_v13 = vld [vmem:[#allocation8 + $0x4c] ss:$12 sps:$4 sm:$0xff]   ;;  %v2523_v15 = vld [vmem:[#allocation8 + $0x48] ss:$12 sps:$4 sm:$0xff]   ;;  %v2527_v19 = vld [vmem:[#allocation8 + $0x30] ss:$12 sps:$4 sm:$0xff]  }
  0x3a   :  { %335 = vmatpush1.bf16.msra.mxu0 %v2511_v6  ;;  %v2524_v16 = vld [vmem:[#allocation8 + $0x34] ss:$12 sps:$4 sm:$0xff]   ;;  %v2526_v17 = vld [vmem:[#allocation8 + $0x38] ss:$12 sps:$4 sm:$0xff]   ;;  %v2528_v20 = vld [vmem:[#allocation8 + $0x1c] ss:$12 sps:$4 sm:$0xff]  }
  0x3b   :  { %2280 = vmatpush3.bf16.msra.mxu1 %v2510_v5  ;;  %336 = vmatprep.subr.bf16.mxu0 %v2512_v7  ;;  %v2530_v21 = vld [vmem:[#allocation8 + $0x20] ss:$12 sps:$4 sm:$0xff]   ;;  %v2531_v22 = vld [vmem:[#allocation8 + $0x18] ss:$12 sps:$4 sm:$0xff]   ;;  %v2534_v24 = vld [vmem:[#allocation8 + $0x8] ss:$12 sps:$4 sm:$0xff]  }
  0x3c   :  { %2281 = vmatprep.subr.bf16.mxu1 %v2514_v8  ;;  %v2532_v23 = vld [vmem:[#allocation8 + $0x4] ss:$12 sps:$4 sm:$0xff]   ;;  %v2535_v25 = vld [vmem:[#allocation8] ss:$12 sps:$4 sm:$0xff]   ;;  %v2956_v28 = vld [vmem:[#allocation10 + $0xa8] ss:$12 sps:$4 sm:$0xff]  }
  0x3d   :  { %v2954_v26 = vld [vmem:[#allocation10 + $0xac] ss:$12 sps:$4 sm:$0xff]   ;;  %v2958_v29 = vld [vmem:[#allocation10 + $0xb0] ss:$12 sps:$4 sm:$0xff]   ;;  %v3709_v30 = vmov 0.0   ;;  %v2554_v39 = vld [vmem:[#allocation5 + $0x20] sm:$0xff]  }
  0x3e   :  { %337 = vmatpush1.bf16.msra.mxu0 %v2515_v9  ;;  %v2537_v27 = vld [vmem:[#allocation5 + $0x8] sm:$0xff]   ;;  %v2962_v31 = vld [vmem:[#allocation10 + $0x94] ss:$12 sps:$4 sm:$0xff]   ;;  %v2964_v33 = vld [vmem:[#allocation10 + $0x90] ss:$12 sps:$4 sm:$0xff]   ;;  %v2890_v58 = vmov 0.0|0.0  }
  0x3f   :  { %2282 = vmatpush3.bf16.msra.mxu1 %v2514_v8  ;;  %338 = vmatprep.subr.bf16.mxu0 %v2516_v10  ;;  %v2545_v32 = vld [vmem:[#allocation5 + $0x10] sm:$0xff]   ;;  %v2968_v34 = vld [vmem:[#allocation10 + $0x98] ss:$12 sps:$4 sm:$0xff]   ;;  %v2972_v35 = vld [vmem:[#allocation10 + $0x7c] ss:$12 sps:$4 sm:$0xff]   ;;  %vm2891_vm0 = vmmov 0  }
  0x40   :  { %2283 = vmatprep.subr.bf16.mxu1 %v2518_v11  ;;  %v2546_v36 = vld [vmem:[#allocation5 + $0x18] sm:$0xff]   ;;  %v2979_v38 = vld [vmem:[#allocation10 + $0x64] ss:$12 sps:$4 sm:$0xff]   ;;  %v2983_v40 = vld [vmem:[#allocation10 + $0x80] ss:$12 sps:$4 sm:$0xff]   ;;  %v3081_v60 = vshrl.u32 %v141_v59, 7 }
  0x41   :  { %v2975_v37 = vld [vmem:[#allocation10 + $0x78] ss:$12 sps:$4 sm:$0xff]   ;;  %v2986_v41 = vld [vmem:[#allocation10 + $0x60] ss:$12 sps:$4 sm:$0xff]   ;;  %v2992_v44 = vld [vmem:[#allocation10 + $0x68] ss:$12 sps:$4 sm:$0xff]  }
  0x42   :  { %339 = vmatpush1.bf16.msra.mxu0 %v2519_v12  ;;  %v2555_v42 = vld [vmem:[#allocation5 + $0x28] sm:$0xff]   ;;  %v2997_v46 = vld [vmem:[#allocation10 + $0x34] ss:$12 sps:$4 sm:$0xff]   ;;  %v3003_v48 = vld [vmem:[#allocation10 + $0x50] ss:$12 sps:$4 sm:$0xff]   ;;  %v3711_v61 = vsub.s32 2, %v3081_v60 }
  0x43   :  { %2284 = vmatpush3.bf16.msra.mxu1 %v2518_v11  ;;  %340 = vmatprep.subr.bf16.mxu0 %v2520_v13  ;;  %v2990_v43 = vld [vmem:[#allocation10 + $0x4c] ss:$12 sps:$4 sm:$0xff]   ;;  %v2994_v45 = vld [vmem:[#allocation10 + $0x48] ss:$12 sps:$4 sm:$0xff]   ;;  %v3006_v49 = vld [vmem:[#allocation10 + $0x30] ss:$12 sps:$4 sm:$0xff]  }
  0x44   :  { %2285 = vmatprep.subr.bf16.mxu1 %v2522_v14  ;;  %v2563_v47 = vld [vmem:[#allocation5 + $0x30] sm:$0xff]   ;;  %v3010_v50 = vld [vmem:[#allocation10 + $0x1c] ss:$12 sps:$4 sm:$0xff]   ;;  %v3015_v52 = vld [vmem:[#allocation10 + $0x18] ss:$12 sps:$4 sm:$0xff]   ;;  %v143_v6 = vsub.s32 0, %v3081_v60 }
  0x45   :  { %v2564_v51 = vld [vmem:[#allocation5 + $0x38] sm:$0xff]   ;;  %v3019_v53 = vld [vmem:[#allocation10 + $0x4] ss:$12 sps:$4 sm:$0xff]   ;;  %v3024_v55 = vld [vmem:[#allocation10] ss:$12 sps:$4 sm:$0xff]   ;;  %v3712_v9 = vsub.s32 1, %v3081_v60 }
  0x46   :  { %341 = vmatpush1.bf16.msra.mxu0 %v2523_v15  ;;  %v3021_v54 = vld [vmem:[#allocation10 + $0x38] ss:$12 sps:$4 sm:$0xff]   ;;  %v3030_v56 = vld [vmem:[#allocation10 + $0x20] ss:$12 sps:$4 sm:$0xff]   ;;  %v3036_v57 = vld [vmem:[#allocation10 + $0x8] ss:$12 sps:$4 sm:$0xff]  }
  0x47   :  { %2286 = vmatpush3.bf16.msra.mxu1 %v2522_v14  ;;  %342 = vmatprep.subr.bf16.mxu0 %v2524_v16  ;;  %v139_v62 = vld [vmem:[%s3702_s3] sm:$0x7]  ;;  %s2892_s25 = smov [#allocation13]  }
  0x48   :  { %2287 = vmatprep.subr.bf16.mxu1 %v2526_v17  ;;  %v3089_v63 = vrot.slane %v139_v62, %v3711_v61  ;;  %v3111_v13 = vrot.slane %v139_v62, %v143_v6  ;;  %v3115_v16 = vrot.slane %v139_v62, %v3712_v9  ;;  %s2062_s26 = sshll.u32 %s2892_s25, 4  ;;  %s2063_s26 = int_to_ptr.vmem [resolvable:$true] %s2062_s26 }
  0x49   :  { %s2852_s27 = scalar_lea.vmem %s2063_s26, 256  ;;  %p2857_p7 = scmp.lt.s32.totalorder %s2063_s26, %s2063_s26 }
  0x4a   :  { %343 = vmatpush1.bf16.msra.mxu0 %v2527_v19  ;;  %p2853_p6 = scmp.ne.s32.totalorder %s2063_s26, %s2852_s27  ;;  %p2858_p8 = scmp.lt.s32.totalorder %s2852_s27, %s2852_s27 }
  0x4b   :  { %2288 = vmatpush3.bf16.msra.mxu1 %v2526_v17  ;;  %344 = vmatprep.subr.bf16.mxu0 %v2528_v20 }
  0x4c   :  { %2289 = vmatprep.subr.bf16.mxu1 %v2530_v21  ;;  %p2859_p9 = por %p2858_p8, %p2857_p7 }
  0x4e   :  { %345 = vmatpush1.bf16.msra.mxu0 %v2531_v22  ;;  %p2860_p10 = pnand %p2859_p9, %p2853_p6 }
  0x4f   :  { %2290 = vmatpush3.bf16.msra.mxu1 %v2530_v21  ;;  %346 = vmatprep.subr.bf16.mxu0 %v2532_v23 }
  0x50   :  { %2291 = vmatprep.subr.bf16.mxu1 %v2534_v24 }
  0x52   :  { %347 = vmatpush1.bf16.msra.mxu0 %v2535_v25 }
  0x53   :  { %2292 = vmatpush3.bf16.msra.mxu1 %v2534_v24  ;;  %2309 = vmatprep.subr.bf16.mxu0 %v3709_v30 }
  0x54   :  { %781 = vmatprep.subr.bf16.mxu1 %v2954_v26 }
  0x55   :  { %365 = vmatmul.mubr.bf16.vlgmr.msra.gmra.mxu0 %v2536_v18 }
  0x56   :  { %2294 = vmatmul.mubr.bf16.vlgmr.msra.gmra.mxu1 %v2537_v27  ;;  %2310 = vmatpush3.bf16.msra.mxu0 %v2958_v29 }
  0x57   :  { %782 = vmatpush1.bf16.msra.mxu1 %v2956_v28  ;;  %374 = vmatprep.mubr.bf16.mxu0 %v3707_v0 }
  0x58   :  { %783 = vmatprep.subr.bf16.mxu1 %v2962_v31  ;;  %2297 = vmatprep.mubr.bf16.mxu1 %v2545_v32 }
  0x59   :  { %2311 = vmatprep.subr.bf16.mxu0 %v3709_v30 }
  0x5a   :  { %2312 = vmatpush3.bf16.msra.mxu0 %v2968_v34 }
  0x5b   :  { %784 = vmatpush1.bf16.msra.mxu1 %v2964_v33  ;;  %2313 = vmatprep.subr.bf16.mxu0 %v3709_v30 }
  0x5c   :  { %785 = vmatprep.subr.bf16.mxu1 %v2972_v35 }
  0x5d   :  { %375 = vmatmul.mubr.bf16.gmra.mxu0 %v2537_v27 }
  0x5e   :  { %2298 = vmatmul.mubr.bf16.gmra.mxu1 %v2546_v36  ;;  %384 = vmatprep.mubr.bf16.mxu0 %v3707_v0 }
  0x5f   :  { %786 = vmatpush1.bf16.msra.mxu1 %v2975_v37  ;;  %2301 = vmatprep.mubr.bf16.mxu1 %v2554_v39 }
  0x60   :  { %787 = vmatprep.subr.bf16.mxu1 %v2979_v38  ;;  %2314 = vmatpush3.bf16.msra.mxu0 %v2983_v40 }
  0x61   :  { %2315 = vmatprep.subr.bf16.mxu0 %v3709_v30 }
  0x63   :  { %788 = vmatpush1.bf16.msra.mxu1 %v2986_v41 }
  0x64   :  { %789 = vmatprep.subr.bf16.mxu1 %v2990_v43  ;;  %2316 = vmatpush3.bf16.msra.mxu0 %v2992_v44 }
  0x65   :  { %385 = vmatmul.mubr.bf16.gmra.mxu0 %v2545_v32  ;;  %2317 = vmatprep.subr.bf16.mxu0 %v3709_v30 }
  0x66   :  { %2302 = vmatmul.mubr.bf16.gmra.mxu1 %v2555_v42  ;;  %394 = vmatprep.mubr.bf16.mxu0 %v3707_v0 }
  0x67   :  { %790 = vmatpush1.bf16.msra.mxu1 %v2994_v45  ;;  %2305 = vmatprep.mubr.bf16.mxu1 %v2563_v47 }
  0x68   :  { %791 = vmatprep.subr.bf16.mxu1 %v2997_v46  ;;  %2318 = vmatpush3.bf16.msra.mxu0 %v3003_v48 }
  0x69   :  { %2319 = vmatprep.subr.bf16.mxu0 %v3709_v30 }
  0x6b   :  { %792 = vmatpush1.bf16.msra.mxu1 %v3006_v49 }
  0x6c   :  { %793 = vmatprep.subr.bf16.mxu1 %v3010_v50  ;;  %2320 = vmatpush3.bf16.msra.mxu0 %v3021_v54 }
  0x6d   :  { %395 = vmatmul.mubr.bf16.gmra.mxu0 %v2546_v36  ;;  %2321 = vmatprep.subr.bf16.mxu0 %v3709_v30 }
  0x6e   :  { %2306 = vmatmul.mubr.bf16.gmra.mxu1 %v2564_v51  ;;  %404 = vmatprep.mubr.bf16.mxu0 %v3707_v0 }
  0x6f   :  { %794 = vmatpush1.bf16.msra.mxu1 %v3015_v52  ;;  %813 = vmatprep.mubr.bf16.mxu1 %v3707_v0 }
  0x70   :  { %795 = vmatprep.subr.bf16.mxu1 %v3019_v53  ;;  %2322 = vmatpush3.bf16.msra.mxu0 %v3030_v56 }
  0x71   :  { %2323 = vmatprep.subr.bf16.mxu0 %v3709_v30 }
  0x73   :  { %796 = vmatpush1.bf16.msra.mxu1 %v3024_v55 }
  0x74   :  { %926 = vmatprep.subr.bf16.mxu1 %v2954_v26  ;;  %2324 = vmatpush3.bf16.msra.mxu0 %v3036_v57 }
  0x75   :  { %405 = vmatmul.mubr.bf16.gmra.mxu0 %v2554_v39  ;;  %2329 = vmatprep.subr.bf16.mxu0 %v3709_v30 }
  0x76   :  { %814 = vmatmul.mubr.bf16.vlgmr.msra.gmra.mxu1 %v2890_v58  ;;  %414 = vmatprep.mubr.bf16.mxu0 %v3707_v0 }
  0x77   :  { %927 = vmatpush1.bf16.msra.mxu1 %v2956_v28  ;;  %958 = vmatprep.mubr.bf16.mxu1 %v3707_v0 }
  0x78   :  { %928 = vmatprep.subr.bf16.mxu1 %v2962_v31 }
  0x7b   :  { %929 = vmatpush1.bf16.msra.mxu1 %v2964_v33 }
  0x7c   :  { %930 = vmatprep.subr.bf16.mxu1 %v2972_v35 }
  0x7d   :  { %415 = vmatmul.mubr.bf16.gmra.mxu0 %v2555_v42 }
  0x7e   :  { %424 = vmatprep.mubr.bf16.mxu0 %v3707_v0 }
  0x7f   :  { %931 = vmatpush1.bf16.msra.mxu1 %v2975_v37 }
  0x80   :  { %932 = vmatprep.subr.bf16.mxu1 %v2979_v38 }
  0x83   :  { %933 = vmatpush1.bf16.msra.mxu1 %v2986_v41 }
  0x84   :  { %934 = vmatprep.subr.bf16.mxu1 %v2990_v43 }
  0x85   :  { %425 = vmatmul.mubr.bf16.gmra.mxu0 %v2563_v47 }
  0x86   :  { %434 = vmatprep.mubr.bf16.mxu0 %v3707_v0 }
  0x87   :  { %935 = vmatpush1.bf16.msra.mxu1 %v2994_v45 }
  0x88   :  { %936 = vmatprep.subr.bf16.mxu1 %v2997_v46 }
  0x8b   :  { %937 = vmatpush1.bf16.msra.mxu1 %v3006_v49 }
  0x8c   :  { %938 = vmatprep.subr.bf16.mxu1 %v3010_v50 }
  0x8d   :  { %435 = vmatmul.mubr.bf16.gmra.mxu0 %v2564_v51 }
  0x8e   :  { %2325 = vmatprep.mubr.msk.bf16.mxu0 %vm2891_vm0, %v3709_v30 }
  0x8f   :  { %939 = vmatpush1.bf16.msra.mxu1 %v3015_v52 }
  0x90   :  { %940 = vmatprep.subr.bf16.mxu1 %v3019_v53 }
  0x93   :  { %941 = vmatpush1.bf16.msra.mxu1 %v3024_v55 }
  0x94   :  { %1071 = vmatprep.subr.bf16.mxu1 %v2954_v26 }
  0x95   :  { %2326 = vmatmul.mubr.bf16.vlgmr.msra.gmra.mxu0 %v2890_v58 }
  0x96   :  { %2330 = vmatpush3.bf16.msra.mxu0 %v2958_v29  ;;  %2345 = vmatprep.mubr.msk.bf16.mxu0 %vm2891_vm0, %v3709_v30 }
  0x97   :  { %2331 = vmatprep.subr.bf16.mxu0 %v3709_v30 }
  0x9a   :  { %2332 = vmatpush3.bf16.msra.mxu0 %v2968_v34 }
  0x9b   :  { %2333 = vmatprep.subr.bf16.mxu0 %v3709_v30 }
  0x9e   :  { %2334 = vmatpush3.bf16.msra.mxu0 %v2983_v40 }
  0x9f   :  { %2335 = vmatprep.subr.bf16.mxu0 %v3709_v30 }
  0xa2   :  { %2336 = vmatpush3.bf16.msra.mxu0 %v2992_v44 }
  0xa3   :  { %2337 = vmatprep.subr.bf16.mxu0 %v3709_v30 }
  0xa6   :  { %2338 = vmatpush3.bf16.msra.mxu0 %v3003_v48 }
  0xa7   :  { %2339 = vmatprep.subr.bf16.mxu0 %v3709_v30 }
  0xaa   :  { %2340 = vmatpush3.bf16.msra.mxu0 %v3021_v54 }
  0xab   :  { %2341 = vmatprep.subr.bf16.mxu0 %v3709_v30 }
  0xae   :  { %2342 = vmatpush3.bf16.msra.mxu0 %v3030_v56 }
  0xaf   :  { %2343 = vmatprep.subr.bf16.mxu0 %v3709_v30 }
  0xb2   :  { %2344 = vmatpush3.bf16.msra.mxu0 %v3036_v57 }
  0xb3   :  { %2349 = vmatprep.subr.bf16.mxu0 %v3709_v30 }
 0x115   :  { %v3091_v1 = vpop.f32.mrf.mxu0 }
 0x116   :  { %v2295_v2 = vpop.f32.mrf.mxu1 }
 0x117   :  { %v3094_v3 = vadd.f32 %v2295_v2, %v3089_v63  ;;  %v3096_v4 = vpop.f32.mrf.mxu0 }
 0x118   :  { %v3098_v5 = vpop.f32.mrf.mxu1 }
 0x119   :  { %v3101_v7 = vpop.f32.mrf.mxu0 }
 0x11a   :  { %v2296_v8 = vpop.f32.mrf.mxu1 }
 0x11b   :  { %v3105_v10 = vadd.f32 %v2296_v8, %v3089_v63  ;;  %v3107_v11 = vpop.f32.mrf.mxu0 }
 0x11c   :  { %v3109_v12 = vpop.f32.mrf.mxu1 }
 0x11d   :  { %v376_v14 = vpop.f32.mrf.mxu0 }
 0x11e   :  { %v2299_v15 = vpop.f32.mrf.mxu1  ;;  %v3118_v17 = vadd.f32 %v376_v14, %v3111_v13 }
 0x11f   :  { %v3121_v18 = vadd.f32 %v2299_v15, %v3089_v63  ;;  %v378_v19 = vpop.f32.mrf.mxu0 }
 0x120   :  { %v495_v20 = vpop.f32.mrf.mxu1  ;;  %v3124_v21 = vadd.f32 %v378_v19, %v3115_v16 }
 0x121   :  { %3713 = vst [vmem:[#allocation18_spill] sm:$0xff] %v3121_v18  ;;  %v3127_v22 = vadd.f32 %v495_v20, %v3089_v63  ;;  %v380_v23 = vpop.f32.mrf.mxu0 }
 0x122   :  { %v2300_v24 = vpop.f32.mrf.mxu1  ;;  %v3130_v25 = vadd.f32 %v380_v23, %v3111_v13 }
 0x123   :  { %v3133_v27 = vadd.f32 %v2300_v24, %v3089_v63  ;;  %v382_v32 = vpop.f32.mrf.mxu0 }
 0x124   :  { %v498_v36 = vpop.f32.mrf.mxu1  ;;  %v3136_v39 = vadd.f32 %v382_v32, %v3115_v16 }
 0x125   :  { %3714 = vst [vmem:[#allocation19_spill] sm:$0xff] %v3133_v27  ;;  %v3139_v42 = vadd.f32 %v498_v36, %v3089_v63  ;;  %v386_v47 = vpop.f32.mrf.mxu0 }
 0x126   :  { %v2303_v51 = vpop.f32.mrf.mxu1  ;;  %v3142_v58 = vadd.f32 %v386_v47, %v3111_v13 }
 0x127   :  { %v3145_v59 = vadd.f32 %v2303_v51, %v3089_v63  ;;  %v388_v62 = vpop.f32.mrf.mxu0 }
 0x128   :  { %v511_v2 = vpop.f32.mrf.mxu1  ;;  %v3148_v8 = vadd.f32 %v388_v62, %v3115_v16 }
 0x129   :  { %3715 = vst [vmem:[#allocation20_spill] sm:$0xff] %v3145_v59  ;;  %v3151_v14 = vadd.f32 %v511_v2, %v3089_v63  ;;  %v390_v15 = vpop.f32.mrf.mxu0 }
 0x12a   :  { %v2304_v19 = vpop.f32.mrf.mxu1  ;;  %v3154_v20 = vadd.f32 %v390_v15, %v3111_v13 }
 0x12b   :  { %3716 = vst [vmem:[#allocation21_spill] sm:$0xff] %v3151_v14  ;;  %v3157_v23 = vadd.f32 %v2304_v19, %v3089_v63  ;;  %v392_v24 = vpop.f32.mrf.mxu0  ;;  %v3174_v19 = vld [vmem:[%s3703_s4] sm:$0x7] }
 0x12c   :  { %v514_v32 = vpop.f32.mrf.mxu1  ;;  %v3160_v36 = vadd.f32 %v392_v24, %v3115_v16 }
 0x12d   :  { %3717 = vst [vmem:[#allocation22_spill] sm:$0xff] %v3157_v23  ;;  %v3163_v47 = vadd.f32 %v514_v32, %v3089_v63  ;;  %v396_v51 = vpop.f32.mrf.mxu0 }
 0x12e   :  { %v2307_v62 = vpop.f32.mrf.mxu1  ;;  %v3166_v2 = vadd.f32 %v396_v51, %v3111_v13 }
 0x12f   :  { %3718 = vst [vmem:[#allocation23_spill] sm:$0xff] %v3163_v47  ;;  %v3169_v0 = vadd.f32 %v2307_v62, %v3089_v63  ;;  %v398_v15 = vpop.f32.mrf.mxu0 }
 0x130   :  { %v527_v30 = vpop.f32.mrf.mxu1  ;;  %v3177_v24 = vadd.f32 %v398_v15, %v3115_v16 }
 0x131   :  { %3719 = vst [vmem:[#allocation24_spill] sm:$0xff] %v3169_v0  ;;  %v3180_v32 = vadd.f32 %v527_v30, %v3089_v63  ;;  %v400_v61 = vpop.f32.mrf.mxu0  ;;  %v3189_v0 = vrot.slane %v3174_v19, %v143_v6 }
 0x132   :  { %3720 = vst [vmem:[#allocation25_spill] sm:$0xff] %v3177_v24  ;;  %v2308_v9 = vpop.f32.mrf.mxu1  ;;  %v3183_v51 = vadd.f32 %v400_v61, %v3111_v13  ;;  %v367_v61 = vadd.f32 %v3091_v1, %v3111_v13 }
 0x133   :  { %3721 = vst [vmem:[#allocation26_spill] sm:$0xff] %v3180_v32  ;;  %v3186_v62 = vadd.f32 %v2308_v9, %v3089_v63  ;;  %v402_v23 = vpop.f32.mrf.mxu0 }
 0x134   :  { %3722 = vst [vmem:[#allocation27_spill] sm:$0xff] %v3183_v51  ;;  %v530_v59 = vpop.f32.mrf.mxu1  ;;  %v3192_v47 = vadd.f32 %v402_v23, %v3115_v16 }
 0x135   :  { %3723 = vst [vmem:[#allocation28_spill] sm:$0xff] %v3186_v62  ;;  %v3195_v15 = vadd.f32 %v530_v59, %v3089_v63  ;;  %v406_v30 = vpop.f32.mrf.mxu0  ;;  %v371_v59 = vadd.f32 %v3101_v7, %v3111_v13 }
 0x136   :  { %3724 = vst [vmem:[#allocation29_spill] sm:$0xff] %v3192_v47  ;;  %v815_v32 = vpop.f32.mrf.mxu1  ;;  %v3200_v14 = vadd.f32 %v406_v30, %v3111_v13 }
 0x137   :  { %3725 = vst [vmem:[#allocation30_spill] sm:$0xff] %v3195_v15  ;;  %v816_v9 = vadd.f32 %v815_v32, %v3189_v0  ;;  %v408_v6 = vpop.f32.mrf.mxu0 }
 0x138   :  { %3726 = vst [vmem:[#allocation31_spill] sm:$0xff] %v3200_v14  ;;  %v817_v62 = vpop.f32.mrf.mxu1  ;;  %v3204_v18 = vadd.f32 %v408_v6, %v3115_v16 }
 0x139   :  { %v865_v27 = vadd.f32 %v816_v9, %v367_v61  ;;  %v410_v23 = vpop.f32.mrf.mxu0  ;;  %v3730_v61 = vsub.s32 1, %v3081_v60 }
 0x13a   :  { %3727 = vst [vmem:[#allocation32_spill] sm:$0xff] %v3204_v18  ;;  %v819_v47 = vpop.f32.mrf.mxu1  ;;  %v3209_v24 = vadd.f32 %v410_v23, %v3111_v13 }
 0x13b   :  { %v2139_v15 = vmul.f32 -1.442695, %v865_v27  ;;  %v820_v1 = vadd.f32 %v819_v47, %v3189_v0  ;;  %v412_v30 = vpop.f32.mrf.mxu0  ;;  %v3218_v9 = vrot.slane %v3174_v19, %v3730_v61 }
 0x13c   :  { %3728 = vst [vmem:[#allocation33_spill] sm:$0xff] %v3209_v24  ;;  %v3213_v14 = vadd.f32 %v412_v30, %v3115_v16  ;;  %v821_v23 = vpop.f32.mrf.mxu1  ;;  %v369_v30 = vadd.f32 %v3096_v4, %v3115_v16 }
 0x13d   :  { %2584 = vpow2.f32 %v2139_v15  ;;  %v866_v32 = vadd.f32 %v820_v1, %v371_v59  ;;  %v416_v6 = vpop.f32.mrf.mxu0  ;;  %v818_v15 = vadd.f32 %v817_v62, %v3218_v9 }
 0x13e   :  { %3729 = vst [vmem:[#allocation34_spill] sm:$0xff] %v3213_v14  ;;  %v3221_v7 = vadd.f32 %v416_v6, %v3111_v13 }
 0x13f   :  { %v2140_v18 = vmul.f32 -1.442695, %v866_v32  ;;  %v418_v27 = vpop.f32.mrf.mxu0  ;;  %v822_v32 = vadd.f32 %v821_v23, %v3218_v9 }
 0x140   :  { %3731 = vst [vmem:[#allocation35_spill] sm:$0xff] %v3221_v7  ;;  %v3224_v47 = vadd.f32 %v418_v27, %v3115_v16  ;;  %v879_v27 = vadd.f32 %v818_v15, %v369_v30 }
 0x141   :  { %2586 = vpow2.f32 %v2140_v18  ;;  %v420_v59 = vpop.f32.mrf.mxu0  ;;  %v373_v18 = vadd.f32 %v3107_v11, %v3115_v16 }
 0x142   :  { %3732 = vst [vmem:[#allocation36_spill] sm:$0xff] %v3224_v47  ;;  %v3228_v1 = vadd.f32 %v420_v59, %v3111_v13  ;;  %v2141_v14 = vmul.f32 -1.442695, %v879_v27 }
 0x143   :  { %v422_v61 = vpop.f32.mrf.mxu0  ;;  %v880_v7 = vadd.f32 %v822_v32, %v373_v18 }
 0x144   :  { %3733 = vst [vmem:[#allocation37_spill] sm:$0xff] %v3228_v1  ;;  %v3234_v6 = vadd.f32 %v422_v61, %v3115_v16 }
 0x145   :  { %v426_v47 = vpop.f32.mrf.mxu0 }
 0x146   :  { %3734 = vst [vmem:[#allocation38_spill] sm:$0xff] %v3234_v6  ;;  %v3239_v62 = vadd.f32 %v426_v47, %v3111_v13  ;;  %v2142_v6 = vmul.f32 -1.442695, %v880_v7 }
 0x147   :  { %v428_v59 = vpop.f32.mrf.mxu0 }
 0x148   :  { %v3242_v1 = vadd.f32 %v428_v59, %v3115_v16 }
 0x149   :  { %v430_v23 = vpop.f32.mrf.mxu0 }
 0x14a   :  { %v2585_v4 = vpop.eup %2584  ;;  %v3245_v61 = vadd.f32 %v430_v23, %v3111_v13 }
 0x14b   :  { %v873_v24 = vadd.f32 1.0, %v2585_v4  ;;  %v432_v51 = vpop.f32.mrf.mxu0 }
 0x14c   :  { %v3248_v11 = vadd.f32 %v432_v51, %v3115_v16 }
 0x14d   :  { %2588 = vrcp.f32 %v873_v24  ;;  %v436_v15 = vpop.f32.mrf.mxu0  ;;  %v3739_v24 = vsub.s32 2, %v3081_v60 }
 0x14e   :  { %3735 = vst [vmem:[#allocation39_spill] sm:$0xff] %v3248_v11  ;;  %v2587_v47 = vpop.eup %2586  ;;  %2590 = vpow2.f32 %v2141_v14  ;;  %v3251_v32 = vadd.f32 %v436_v15, %v3111_v13 }
 0x14f   :  { %v874_v30 = vadd.f32 1.0, %v2587_v47  ;;  %2592 = vpow2.f32 %v2142_v6  ;;  %v438_v18 = vpop.f32.mrf.mxu0  ;;  %v3262_v51 = vrot.slane %v3174_v19, %v3739_v24 }
 0x150   :  { %3736 = vst [vmem:[#allocation40_spill] sm:$0xff] %v3251_v32  ;;  %v3254_v27 = vadd.f32 %v438_v18, %v3115_v16 }
 0x151   :  { %2594 = vrcp.f32 %v874_v30  ;;  %v440_v59 = vpop.f32.mrf.mxu0 }
 0x152   :  { %3737 = vst [vmem:[#allocation41_spill] sm:$0xff] %v3254_v27  ;;  %v3257_v7 = vadd.f32 %v440_v59, %v3111_v13  ;;  %v480_v13 = vadd.f32 %v3098_v5, %v3089_v63 }
 0x153   :  { %v442_v14 = vpop.f32.mrf.mxu0 }
 0x154   :  { %3738 = vst [vmem:[#allocation42_spill] sm:$0xff] %v3257_v7  ;;  %v3265_v4 = vadd.f32 %v442_v14, %v3115_v16  ;;  %v483_v16 = vadd.f32 %v3109_v12, %v3089_v63  ;;  %v3741_v12 = vmov 0.0  }
 0x155   :  { %v858_v23 = vpop.f32.mrf.mxu0 }
 0x156   :  { %3740 = vst [vmem:[#allocation43_spill] sm:$0xff] %v3265_v4  ;;  %v859_v6 = vadd.f32 %v858_v23, %v3262_v51 }
 0x157   :  { %v2327_v47 = vpop.f32.mrf.mxu0 }
 0x159   :  { %v861_v30 = vpop.f32.mrf.mxu0 }
 0x15a   :  { %v2589_v15 = vpop.eup %2588  ;;  %v862_v19 = vadd.f32 %v861_v30, %v3262_v51 }
 0x15b   :  { %v2591_v18 = vpop.eup %2590  ;;  %v893_v59 = vmul.f32 %v2589_v15, %v859_v6  ;;  %v2328_v27 = vpop.f32.mrf.mxu0 }
 0x15c   :  { %v2593_v60 = vpop.eup %2592  ;;  %v887_v32 = vadd.f32 1.0, %v2591_v18 }
 0x15d   :  { %v895_v7 = vadd.f32 %v893_v59, %v480_v13  ;;  %v888_v23 = vadd.f32 1.0, %v2593_v60 }
 0x15e   :  { %v2595_v24 = vpop.eup %2594 }
 0x15f   :  { %2596 = vtanh.f32 %v895_v7  ;;  %v894_v14 = vmul.f32 %v2595_v24, %v862_v19 }
 0x160   :  { %2598 = vrcp.f32 %v887_v32  ;;  %v3742_v32 = vmov 0  }
 0x161   :  { %v896_v47 = vadd.f32 %v894_v14, %v483_v16 }
 0x163   :  { %2600 = vtanh.f32 %v896_v47 }
 0x164   :  { %2602 = vrcp.f32 %v888_v23 }
 0x16c   :  { %v2597_v4 = vpop.eup %2596 }
 0x16d   :  { %v899_v5 = vsub.f32 0.0, %v2597_v4  ;;  %v2599_v6 = vpop.eup %2598 }
 0x16f   :  { %v901_v13 = vmul.f32 %v2599_v6, %v899_v5 }
 0x170   :  { %v2601_v27 = vpop.eup %2600 }
 0x171   :  { %v900_v15 = vsub.f32 0.0, %v2601_v27  ;;  %v2603_v59 = vpop.eup %2602  ;;  %v3273_v11 = vadd.f32 %v2597_v4, %v901_v13 }
 0x173   :  { %v902_v30 = vmul.f32 %v2603_v59, %v900_v15 }
 0x175   :  { %v3275_v18 = vadd.f32 %v2601_v27, %v902_v30 }
 0x177   :  { %v925_v63 = vpack.c.bf16 %v3275_v18, %v3273_v11 }
 0x179   :  { %959 = vmatmul.mubr.bf16.vlgmr.msra.gmra.mxu1 %v925_v63  ;;  %2346 = vmatmul.mubr.bf16.vlgmr.msra.gmra.mxu0 %v925_v63 }
 0x17a   :  { %1072 = vmatpush1.bf16.msra.mxu1 %v2956_v28  ;;  %2350 = vmatpush3.bf16.msra.mxu0 %v2958_v29 }
 0x17b   :  { %1073 = vmatprep.subr.bf16.mxu1 %v2962_v31  ;;  %2351 = vmatprep.subr.bf16.mxu0 %v3741_v12 }
 0x17c   :  { %1103 = vmatprep.mubr.bf16.mxu1 %v3742_v32  ;;  %2365 = vmatprep.mubr.msk.bf16.mxu0 %vm2891_vm0, %v3741_v12 }
 0x17e   :  { %1074 = vmatpush1.bf16.msra.mxu1 %v2964_v33  ;;  %2352 = vmatpush3.bf16.msra.mxu0 %v2968_v34 }
 0x17f   :  { %1075 = vmatprep.subr.bf16.mxu1 %v2972_v35  ;;  %2353 = vmatprep.subr.bf16.mxu0 %v3741_v12 }
 0x182   :  { %1076 = vmatpush1.bf16.msra.mxu1 %v2975_v37  ;;  %2354 = vmatpush3.bf16.msra.mxu0 %v2983_v40 }
 0x183   :  { %1077 = vmatprep.subr.bf16.mxu1 %v2979_v38  ;;  %2355 = vmatprep.subr.bf16.mxu0 %v3741_v12 }
 0x186   :  { %1078 = vmatpush1.bf16.msra.mxu1 %v2986_v41  ;;  %2356 = vmatpush3.bf16.msra.mxu0 %v2992_v44 }
 0x187   :  { %1079 = vmatprep.subr.bf16.mxu1 %v2990_v43  ;;  %2357 = vmatprep.subr.bf16.mxu0 %v3741_v12 }
 0x18a   :  { %1080 = vmatpush1.bf16.msra.mxu1 %v2994_v45  ;;  %2358 = vmatpush3.bf16.msra.mxu0 %v3003_v48 }
 0x18b   :  { %1081 = vmatprep.subr.bf16.mxu1 %v2997_v46  ;;  %2359 = vmatprep.subr.bf16.mxu0 %v3741_v12 }
 0x18e   :  { %1082 = vmatpush1.bf16.msra.mxu1 %v3006_v49  ;;  %2360 = vmatpush3.bf16.msra.mxu0 %v3021_v54 }
 0x18f   :  { %1083 = vmatprep.subr.bf16.mxu1 %v3010_v50  ;;  %2361 = vmatprep.subr.bf16.mxu0 %v3741_v12 }
 0x192   :  { %1084 = vmatpush1.bf16.msra.mxu1 %v3015_v52  ;;  %2362 = vmatpush3.bf16.msra.mxu0 %v3030_v56 }
 0x193   :  { %1085 = vmatprep.subr.bf16.mxu1 %v3019_v53  ;;  %2363 = vmatprep.subr.bf16.mxu0 %v3741_v12 }
 0x196   :  { %1086 = vmatpush1.bf16.msra.mxu1 %v3024_v55  ;;  %2364 = vmatpush3.bf16.msra.mxu0 %v3036_v57 }
 0x197   :  { %1216 = vmatprep.subr.bf16.mxu1 %v2954_v26  ;;  %2369 = vmatprep.subr.bf16.mxu0 %v3741_v12 }
 0x239   :  { %v960_v7 = vpop.f32.mrf.mxu1  ;;  %v1003_v4 = vpop.f32.mrf.mxu0 }
 0x23a   :  { %v961_v60 = vadd.f32 %v960_v7, %v3189_v0 }
 0x23b   :  { %v962_v19 = vpop.f32.mrf.mxu1  ;;  %v2347_v24 = vpop.f32.mrf.mxu0 }
 0x23c   :  { %v1010_v16 = vadd.f32 %v961_v60, %v3118_v17  ;;  %v963_v13 = vadd.f32 %v962_v19, %v3218_v9  ;;  %v1004_v19 = vadd.f32 %v1003_v4, %v3262_v51 }
 0x23d   :  { %v964_v14 = vpop.f32.mrf.mxu1  ;;  %v1006_v23 = vpop.f32.mrf.mxu0 }
 0x23e   :  { %v2143_v47 = vmul.f32 -1.442695, %v1010_v16  ;;  %v965_v5 = vadd.f32 %v964_v14, %v3189_v0  ;;  %v1024_v30 = vadd.f32 %v963_v13, %v3124_v21 }
 0x23f   :  { %v2348_v6 = vpop.f32.mrf.mxu0  ;;  %v966_v59 = vpop.f32.mrf.mxu1 }
 0x240   :  { %2604 = vpow2.f32 %v2143_v47  ;;  %v1011_v27 = vadd.f32 %v965_v5, %v3130_v25  ;;  %v967_v63 = vadd.f32 %v966_v59, %v3218_v9  ;;  %v2145_v7 = vmul.f32 -1.442695, %v1024_v30 }
 0x242   :  { %v2144_v15 = vmul.f32 -1.442695, %v1011_v27  ;;  %v1025_v17 = vadd.f32 %v967_v63, %v3136_v39  ;;  %v1007_v39 = vadd.f32 %v1006_v23, %v3262_v51 }
 0x244   :  { %2606 = vpow2.f32 %v2144_v15  ;;  %v2146_v16 = vmul.f32 -1.442695, %v1025_v17 }
 0x245   :  { %2608 = vpow2.f32 %v2145_v7 }
 0x24d   :  { %v2605_v60 = vpop.eup %2604 }
 0x24e   :  { %v1018_v24 = vadd.f32 1.0, %v2605_v60 }
 0x250   :  { %2610 = vrcp.f32 %v1018_v24 }
 0x251   :  { %v2607_v14 = vpop.eup %2606  ;;  %2612 = vpow2.f32 %v2146_v16 }
 0x252   :  { %v1019_v47 = vadd.f32 1.0, %v2607_v14  ;;  %v2609_v25 = vpop.eup %2608 }
 0x253   :  { %v1032_v15 = vadd.f32 1.0, %v2609_v25 }
 0x254   :  { %2614 = vrcp.f32 %v1019_v47 }
 0x25d   :  { %v2611_v5 = vpop.eup %2610 }
 0x25e   :  { %v1038_v6 = vmul.f32 %v2611_v5, %v1004_v19  ;;  %v2613_v21 = vpop.eup %2612 }
 0x25f   :  { %v1033_v63 = vadd.f32 1.0, %v2613_v21 }
 0x260   :  { %v1040_v27 = vadd.f32 %v1038_v6, %v3094_v3 }
 0x261   :  { %v2615_v13 = vpop.eup %2614 }
 0x262   :  { %2616 = vtanh.f32 %v1040_v27  ;;  %v1039_v59 = vmul.f32 %v2615_v13, %v1007_v39 }
 0x263   :  { %2618 = vrcp.f32 %v1032_v15 }
 0x264   :  { %v1041_v30 = vadd.f32 %v1039_v59, %v3105_v10 }
 0x266   :  { %2620 = vtanh.f32 %v1041_v30 }
 0x267   :  { %2622 = vrcp.f32 %v1033_v63 }
 0x26f   :  { %v2617_v7 = vpop.eup %2616 }
 0x270   :  { %v1044_v4 = vsub.f32 %v3273_v11, %v2617_v7  ;;  %v2619_v17 = vpop.eup %2618 }
 0x272   :  { %v1046_v60 = vmul.f32 %v2619_v17, %v1044_v4 }
 0x273   :  { %v2621_v24 = vpop.eup %2620 }
 0x274   :  { %v1045_v3 = vsub.f32 %v3275_v18, %v2621_v24  ;;  %v3328_v16 = vadd.f32 %v2617_v7, %v1046_v60  ;;  %v2623_v23 = vpop.eup %2622 }
 0x276   :  { %v1047_v14 = vmul.f32 %v2623_v23, %v1045_v3 }
 0x278   :  { %v3330_v47 = vadd.f32 %v2621_v24, %v1047_v14 }
 0x27a   :  { %v1070_v10 = vpack.c.bf16 %v3330_v47, %v3328_v16 }
 0x27c   :  { %1104 = vmatmul.mubr.bf16.vlgmr.msra.gmra.mxu1 %v1070_v10  ;;  %2366 = vmatmul.mubr.bf16.vlgmr.msra.gmra.mxu0 %v1070_v10 }
 0x27d   :  { %1217 = vmatpush1.bf16.msra.mxu1 %v2956_v28  ;;  %2370 = vmatpush3.bf16.msra.mxu0 %v2958_v29 }
 0x27e   :  { %1218 = vmatprep.subr.bf16.mxu1 %v2962_v31  ;;  %2371 = vmatprep.subr.bf16.mxu0 %v3741_v12 }
 0x27f   :  { %1248 = vmatprep.mubr.bf16.mxu1 %v3742_v32  ;;  %2385 = vmatprep.mubr.msk.bf16.mxu0 %vm2891_vm0, %v3741_v12 }
 0x281   :  { %1219 = vmatpush1.bf16.msra.mxu1 %v2964_v33  ;;  %2372 = vmatpush3.bf16.msra.mxu0 %v2968_v34 }
 0x282   :  { %1220 = vmatprep.subr.bf16.mxu1 %v2972_v35  ;;  %2373 = vmatprep.subr.bf16.mxu0 %v3741_v12 }
 0x285   :  { %1221 = vmatpush1.bf16.msra.mxu1 %v2975_v37  ;;  %2374 = vmatpush3.bf16.msra.mxu0 %v2983_v40 }
 0x286   :  { %1222 = vmatprep.subr.bf16.mxu1 %v2979_v38  ;;  %2375 = vmatprep.subr.bf16.mxu0 %v3741_v12 }
 0x289   :  { %1223 = vmatpush1.bf16.msra.mxu1 %v2986_v41  ;;  %2376 = vmatpush3.bf16.msra.mxu0 %v2992_v44 }
 0x28a   :  { %1224 = vmatprep.subr.bf16.mxu1 %v2990_v43  ;;  %2377 = vmatprep.subr.bf16.mxu0 %v3741_v12 }
 0x28d   :  { %1225 = vmatpush1.bf16.msra.mxu1 %v2994_v45  ;;  %2378 = vmatpush3.bf16.msra.mxu0 %v3003_v48 }
 0x28e   :  { %1226 = vmatprep.subr.bf16.mxu1 %v2997_v46  ;;  %2379 = vmatprep.subr.bf16.mxu0 %v3741_v12 }
 0x291   :  { %1227 = vmatpush1.bf16.msra.mxu1 %v3006_v49  ;;  %2380 = vmatpush3.bf16.msra.mxu0 %v3021_v54 }
 0x292   :  { %1228 = vmatprep.subr.bf16.mxu1 %v3010_v50  ;;  %2381 = vmatprep.subr.bf16.mxu0 %v3741_v12 }
 0x295   :  { %1229 = vmatpush1.bf16.msra.mxu1 %v3015_v52  ;;  %2382 = vmatpush3.bf16.msra.mxu0 %v3030_v56 }
 0x296   :  { %1230 = vmatprep.subr.bf16.mxu1 %v3019_v53  ;;  %2383 = vmatprep.subr.bf16.mxu0 %v3741_v12 }
 0x299   :  { %1231 = vmatpush1.bf16.msra.mxu1 %v3024_v55  ;;  %2384 = vmatpush3.bf16.msra.mxu0 %v3036_v57 }
 0x29a   :  { %1361 = vmatprep.subr.bf16.mxu1 %v2954_v26  ;;  %2389 = vmatprep.subr.bf16.mxu0 %v3741_v12 }
 0x33c   :  { %v1105_v28 = vpop.f32.mrf.mxu1  ;;  %v1148_v29 = vpop.f32.mrf.mxu0 }
 0x33d   :  { %v1106_v31 = vadd.f32 %v1105_v28, %v3189_v0  ;;  %v1149_v14 = vadd.f32 %v1148_v29, %v3262_v51 }
 0x33e   :  { %v1107_v25 = vpop.f32.mrf.mxu1  ;;  %v2367_v19 = vpop.f32.mrf.mxu0 }
 0x33f   :  { %v1155_v5 = vadd.f32 %v1106_v31, %v3142_v58  ;;  %v1108_v59 = vadd.f32 %v1107_v25, %v3218_v9 }
 0x340   :  { %v1109_v6 = vpop.f32.mrf.mxu1  ;;  %v1151_v21 = vpop.f32.mrf.mxu0 }
 0x341   :  { %v2147_v27 = vmul.f32 -1.442695, %v1155_v5  ;;  %v1110_v15 = vadd.f32 %v1109_v6, %v3189_v0  ;;  %v1169_v63 = vadd.f32 %v1108_v59, %v3148_v8 }
 0x342   :  { %v2368_v39 = vpop.f32.mrf.mxu0  ;;  %v1111_v30 = vpop.f32.mrf.mxu1 }
 0x343   :  { %2624 = vpow2.f32 %v2147_v27  ;;  %v1156_v13 = vadd.f32 %v1110_v15, %v3154_v20  ;;  %v1112_v7 = vadd.f32 %v1111_v30, %v3218_v9  ;;  %v2149_v4 = vmul.f32 -1.442695, %v1169_v63 }
 0x345   :  { %v2148_v26 = vmul.f32 -1.442695, %v1156_v13  ;;  %v1170_v58 = vadd.f32 %v1112_v7, %v3160_v36  ;;  %v1152_v36 = vadd.f32 %v1151_v21, %v3262_v51  ;;  %v3389_v7 = vld [vmem:[#allocation10 + $0xa8] ss:$12 sps:$4 sm:$0xff]  }
 0x347   :  { %2626 = vpow2.f32 %v2148_v26  ;;  %v2150_v24 = vmul.f32 -1.442695, %v1170_v58  ;;  %v3395_v58 = vld [vmem:[#allocation10 + $0x94] ss:$12 sps:$4 sm:$0xff]  }
 0x348   :  { %2628 = vpow2.f32 %v2149_v4  ;;  %v3392_v4 = vld [vmem:[#allocation10 + $0xb0] ss:$12 sps:$4 sm:$0xff]  }
 0x350   :  { %v2625_v17 = vpop.eup %2624 }
 0x351   :  { %v1163_v60 = vadd.f32 1.0, %v2625_v17 }
 0x353   :  { %2630 = vrcp.f32 %v1163_v60 }
 0x354   :  { %v2627_v3 = vpop.eup %2626  ;;  %2632 = vpow2.f32 %v2150_v24 }
 0x355   :  { %v1164_v23 = vadd.f32 1.0, %v2627_v3  ;;  %v2629_v20 = vpop.eup %2628 }
 0x356   :  { %v1177_v25 = vadd.f32 1.0, %v2629_v20 }
 0x357   :  { %2634 = vrcp.f32 %v1164_v23 }
 0x360   :  { %v2631_v10 = vpop.eup %2630 }
 0x361   :  { %v1183_v28 = vmul.f32 %v2631_v10, %v1149_v14  ;;  %v2633_v8 = vpop.eup %2632 }
 0x362   :  { %v1178_v27 = vadd.f32 1.0, %v2633_v8 }
 0x363   :  { %v1185_v31 = vadd.f32 %v1183_v28, %v3127_v22 }
 0x364   :  { %v2635_v19 = vpop.eup %2634 }
 0x365   :  { %2636 = vtanh.f32 %v1185_v31  ;;  %v1184_v5 = vmul.f32 %v2635_v19, %v1152_v36  ;;  %v3746_v36 = vld [vmem:[#allocation18_spill] sm:$0xff] }
 0x366   :  { %2638 = vrcp.f32 %v1177_v25 }
 0x367   :  { %v1186_v6 = vadd.f32 %v1184_v5, %v3139_v42 }
 0x369   :  { %2640 = vtanh.f32 %v1186_v6 }
 0x36a   :  { %2642 = vrcp.f32 %v1178_v27 }
 0x372   :  { %v2637_v15 = vpop.eup %2636 }
 0x373   :  { %v1189_v29 = vsub.f32 %v3328_v16, %v2637_v15  ;;  %v2639_v39 = vpop.eup %2638 }
 0x375   :  { %v1191_v13 = vmul.f32 %v2639_v39, %v1189_v29  ;;  %v3747_v29 = vld [vmem:[#allocation19_spill] sm:$0xff] }
 0x376   :  { %v2641_v26 = vpop.eup %2640 }
 0x377   :  { %v1190_v22 = vsub.f32 %v3330_v47, %v2641_v26  ;;  %v3383_v59 = vadd.f32 %v2637_v15, %v1191_v13  ;;  %v2643_v21 = vpop.eup %2642 }
 0x379   :  { %v1192_v30 = vmul.f32 %v2643_v21, %v1190_v22 }
 0x37b   :  { %v3385_v63 = vadd.f32 %v2641_v26, %v1192_v30 }
 0x37d   :  { %v1215_v42 = vpack.c.bf16 %v3385_v63, %v3383_v59 }
 0x37f   :  { %1249 = vmatmul.mubr.bf16.vlgmr.msra.gmra.mxu1 %v1215_v42  ;;  %2386 = vmatmul.mubr.bf16.vlgmr.msra.gmra.mxu0 %v1215_v42 }
 0x380   :  { %1362 = vmatpush1.bf16.msra.mxu1 %v3389_v7  ;;  %2390 = vmatpush3.bf16.msra.mxu0 %v3392_v4 }
 0x381   :  { %1363 = vmatprep.subr.bf16.mxu1 %v3395_v58  ;;  %2391 = vmatprep.subr.bf16.mxu0 %v3741_v12 }
 0x382   :  { %1393 = vmatprep.mubr.bf16.mxu1 %v3742_v32  ;;  %2405 = vmatprep.mubr.msk.bf16.mxu0 %vm2891_vm0, %v3741_v12 }
 0x384   :  { %1364 = vmatpush1.bf16.msra.mxu1 %v2964_v33  ;;  %2392 = vmatpush3.bf16.msra.mxu0 %v2968_v34  ;;  %v3428_v33 = vld [vmem:[#allocation10 + $0xac] ss:$12 sps:$4 sm:$0xff]  }
 0x385   :  { %1365 = vmatprep.subr.bf16.mxu1 %v2972_v35  ;;  %2393 = vmatprep.subr.bf16.mxu0 %v3741_v12 }
 0x388   :  { %1366 = vmatpush1.bf16.msra.mxu1 %v2975_v37  ;;  %2394 = vmatpush3.bf16.msra.mxu0 %v2983_v40 }
 0x389   :  { %1367 = vmatprep.subr.bf16.mxu1 %v2979_v38  ;;  %2395 = vmatprep.subr.bf16.mxu0 %v3741_v12 }
 0x38c   :  { %1368 = vmatpush1.bf16.msra.mxu1 %v2986_v41  ;;  %2396 = vmatpush3.bf16.msra.mxu0 %v2992_v44 }
 0x38d   :  { %1369 = vmatprep.subr.bf16.mxu1 %v2990_v43  ;;  %2397 = vmatprep.subr.bf16.mxu0 %v3741_v12 }
 0x390   :  { %1370 = vmatpush1.bf16.msra.mxu1 %v2994_v45  ;;  %2398 = vmatpush3.bf16.msra.mxu0 %v3003_v48 }
 0x391   :  { %1371 = vmatprep.subr.bf16.mxu1 %v2997_v46  ;;  %2399 = vmatprep.subr.bf16.mxu0 %v3741_v12 }
 0x394   :  { %1372 = vmatpush1.bf16.msra.mxu1 %v3006_v49  ;;  %2400 = vmatpush3.bf16.msra.mxu0 %v3021_v54  ;;  %v3743_v49 = vld [vmem:[#allocation27_spill] sm:$0xff] }
 0x395   :  { %1373 = vmatprep.subr.bf16.mxu1 %v3010_v50  ;;  %2401 = vmatprep.subr.bf16.mxu0 %v3741_v12 }
 0x398   :  { %1374 = vmatpush1.bf16.msra.mxu1 %v3015_v52  ;;  %2402 = vmatpush3.bf16.msra.mxu0 %v3030_v56 }
 0x399   :  { %1375 = vmatprep.subr.bf16.mxu1 %v3019_v53  ;;  %2403 = vmatprep.subr.bf16.mxu0 %v3741_v12 }
 0x39c   :  { %1376 = vmatpush1.bf16.msra.mxu1 %v3024_v55  ;;  %2404 = vmatpush3.bf16.msra.mxu0 %v3036_v57  ;;  %v3744_v55 = vld [vmem:[#allocation25_spill] sm:$0xff] }
 0x39d   :  { %1506 = vmatprep.subr.bf16.mxu1 %v3428_v33  ;;  %2409 = vmatprep.subr.bf16.mxu0 %v3741_v12 }
 0x43f   :  { %v1250_v34 = vpop.f32.mrf.mxu1  ;;  %v1293_v35 = vpop.f32.mrf.mxu0 }
 0x440   :  { %v1251_v37 = vadd.f32 %v1250_v34, %v3189_v0  ;;  %v1294_v28 = vadd.f32 %v1293_v35, %v3262_v51 }
 0x441   :  { %v1252_v38 = vpop.f32.mrf.mxu1  ;;  %v2387_v40 = vpop.f32.mrf.mxu0 }
 0x442   :  { %v1300_v41 = vadd.f32 %v1251_v37, %v3166_v2  ;;  %v1253_v53 = vadd.f32 %v1252_v38, %v3218_v9  ;;  %v3745_v2 = vld [vmem:[#allocation29_spill] sm:$0xff] }
 0x443   :  { %v1254_v43 = vpop.f32.mrf.mxu1  ;;  %v1296_v44 = vpop.f32.mrf.mxu0 }
 0x444   :  { %v2151_v45 = vmul.f32 -1.442695, %v1300_v41  ;;  %v1255_v46 = vadd.f32 %v1254_v43, %v3189_v0  ;;  %v1314_v56 = vadd.f32 %v1253_v53, %v3744_v55  ;;  %v1297_v6 = vadd.f32 %v1296_v44, %v3262_v51  ;;  %v3459_v43 = vld [vmem:[#allocation10 + $0x90] ss:$12 sps:$4 sm:$0xff]   ;;  %v3462_v44 = vld [vmem:[#allocation10 + $0x98] ss:$12 sps:$4 sm:$0xff]  }
 0x445   :  { %v2388_v48 = vpop.f32.mrf.mxu0  ;;  %v1256_v54 = vpop.f32.mrf.mxu1  ;;  %v3485_v53 = vld [vmem:[#allocation10 + $0x4c] ss:$12 sps:$4 sm:$0xff]   ;;  %v3492_v55 = vld [vmem:[#allocation10 + $0x50] ss:$12 sps:$4 sm:$0xff]  }
 0x446   :  { %2644 = vpow2.f32 %v2151_v45  ;;  %v1301_v50 = vadd.f32 %v1255_v46, %v3743_v49  ;;  %v1257_v57 = vadd.f32 %v1256_v54, %v3218_v9  ;;  %v2153_v17 = vmul.f32 -1.442695, %v1314_v56  ;;  %v3465_v45 = vld [vmem:[#allocation10 + $0x7c] ss:$12 sps:$4 sm:$0xff]   ;;  %v3469_v46 = vld [vmem:[#allocation10 + $0x78] ss:$12 sps:$4 sm:$0xff]  }
 0x447   :  { %v3472_v48 = vld [vmem:[#allocation10 + $0x80] ss:$12 sps:$4 sm:$0xff]   ;;  %v3475_v49 = vld [vmem:[#allocation10 + $0x64] ss:$12 sps:$4 sm:$0xff]   ;;  %v3489_v54 = vld [vmem:[#allocation10 + $0x48] ss:$12 sps:$4 sm:$0xff]  }
 0x448   :  { %v2152_v52 = vmul.f32 -1.442695, %v1301_v50  ;;  %v1315_v60 = vadd.f32 %v1257_v57, %v3745_v2  ;;  %v3479_v50 = vld [vmem:[#allocation10 + $0x60] ss:$12 sps:$4 sm:$0xff]   ;;  %v3499_v57 = vld [vmem:[#allocation10 + $0x30] ss:$12 sps:$4 sm:$0xff]  }
 0x449   :  { %v3495_v56 = vld [vmem:[#allocation10 + $0x34] ss:$12 sps:$4 sm:$0xff]   ;;  %v3505_v2 = vld [vmem:[#allocation10 + $0x1c] ss:$12 sps:$4 sm:$0xff]  }
 0x44a   :  { %2646 = vpow2.f32 %v2152_v52  ;;  %v2154_v23 = vmul.f32 -1.442695, %v1315_v60  ;;  %v3482_v52 = vld [vmem:[#allocation10 + $0x68] ss:$12 sps:$4 sm:$0xff]   ;;  %v3509_v60 = vld [vmem:[#allocation10 + $0x18] ss:$12 sps:$4 sm:$0xff]  }
 0x44b   :  { %2648 = vpow2.f32 %v2153_v17  ;;  %v3502_v17 = vld [vmem:[#allocation10 + $0x38] ss:$12 sps:$4 sm:$0xff]  }
 0x453   :  { %v2645_v24 = vpop.eup %2644 }
 0x454   :  { %v1308_v3 = vadd.f32 1.0, %v2645_v24  ;;  %v3512_v24 = vld [vmem:[#allocation10 + $0x20] ss:$12 sps:$4 sm:$0xff]  }
 0x456   :  { %2650 = vrcp.f32 %v1308_v3  ;;  %v3515_v3 = vld [vmem:[#allocation10 + $0x4] ss:$12 sps:$4 sm:$0xff]  }
 0x457   :  { %v2647_v20 = vpop.eup %2646  ;;  %2652 = vpow2.f32 %v2154_v23  ;;  %v3519_v23 = vld [vmem:[#allocation10] ss:$12 sps:$4 sm:$0xff]  }
 0x458   :  { %v1309_v14 = vadd.f32 1.0, %v2647_v20  ;;  %v2649_v10 = vpop.eup %2648  ;;  %v3522_v20 = vld [vmem:[#allocation10 + $0x8] ss:$12 sps:$4 sm:$0xff]  }
 0x459   :  { %v1322_v5 = vadd.f32 1.0, %v2649_v10 }
 0x45a   :  { %2654 = vrcp.f32 %v1309_v14 }
 0x463   :  { %v2651_v8 = vpop.eup %2650 }
 0x464   :  { %v1328_v31 = vmul.f32 %v2651_v8, %v1294_v28  ;;  %v2653_v25 = vpop.eup %2652 }
 0x465   :  { %v1323_v13 = vadd.f32 1.0, %v2653_v25  ;;  %v3748_v25 = vld [vmem:[#allocation31_spill] sm:$0xff] }
 0x466   :  { %v1330_v19 = vadd.f32 %v1328_v31, %v3746_v36 }
 0x467   :  { %v2655_v27 = vpop.eup %2654 }
 0x468   :  { %2656 = vtanh.f32 %v1330_v19  ;;  %v1329_v15 = vmul.f32 %v2655_v27, %v1297_v6 }
 0x469   :  { %2658 = vrcp.f32 %v1322_v5 }
 0x46a   :  { %v1331_v39 = vadd.f32 %v1329_v15, %v3747_v29  ;;  %v3749_v29 = vld [vmem:[#allocation33_spill] sm:$0xff] }
 0x46c   :  { %2660 = vtanh.f32 %v1331_v39 }
 0x46d   :  { %2662 = vrcp.f32 %v1323_v13 }
 0x475   :  { %v2657_v26 = vpop.eup %2656 }
 0x476   :  { %v1334_v22 = vsub.f32 %v3383_v59, %v2657_v26  ;;  %v2659_v21 = vpop.eup %2658 }
 0x478   :  { %v1336_v30 = vmul.f32 %v2659_v21, %v1334_v22  ;;  %v3750_v21 = vld [vmem:[#allocation32_spill] sm:$0xff] }
 0x479   :  { %v2661_v42 = vpop.eup %2660 }
 0x47a   :  { %v1335_v34 = vsub.f32 %v3385_v63, %v2661_v42  ;;  %v3446_v35 = vadd.f32 %v2657_v26, %v1336_v30  ;;  %v2663_v37 = vpop.eup %2662 }
 0x47c   :  { %v1337_v38 = vmul.f32 %v2663_v37, %v1335_v34  ;;  %v3751_v37 = vld [vmem:[#allocation34_spill] sm:$0xff] }
 0x47e   :  { %v3448_v40 = vadd.f32 %v2661_v42, %v1337_v38 }
 0x480   :  { %v1360_v41 = vpack.c.bf16 %v3448_v40, %v3446_v35 }
 0x482   :  { %1394 = vmatmul.mubr.bf16.vlgmr.msra.gmra.mxu1 %v1360_v41  ;;  %2406 = vmatmul.mubr.bf16.vlgmr.msra.gmra.mxu0 %v1360_v41 }
 0x483   :  { %1507 = vmatpush1.bf16.msra.mxu1 %v3389_v7  ;;  %2410 = vmatpush3.bf16.msra.mxu0 %v3392_v4 }
 0x484   :  { %1508 = vmatprep.subr.bf16.mxu1 %v3395_v58  ;;  %2411 = vmatprep.subr.bf16.mxu0 %v3741_v12 }
 0x485   :  { %1538 = vmatprep.mubr.bf16.mxu1 %v3742_v32  ;;  %2425 = vmatprep.mubr.msk.bf16.mxu0 %vm2891_vm0, %v3741_v12 }
 0x487   :  { %1509 = vmatpush1.bf16.msra.mxu1 %v3459_v43  ;;  %2412 = vmatpush3.bf16.msra.mxu0 %v3462_v44 }
 0x488   :  { %1510 = vmatprep.subr.bf16.mxu1 %v3465_v45  ;;  %2413 = vmatprep.subr.bf16.mxu0 %v3741_v12 }
 0x48b   :  { %1511 = vmatpush1.bf16.msra.mxu1 %v3469_v46  ;;  %2414 = vmatpush3.bf16.msra.mxu0 %v3472_v48 }
 0x48c   :  { %1512 = vmatprep.subr.bf16.mxu1 %v3475_v49  ;;  %2415 = vmatprep.subr.bf16.mxu0 %v3741_v12 }
 0x48f   :  { %1513 = vmatpush1.bf16.msra.mxu1 %v3479_v50  ;;  %2416 = vmatpush3.bf16.msra.mxu0 %v3482_v52 }
 0x490   :  { %1514 = vmatprep.subr.bf16.mxu1 %v3485_v53  ;;  %2417 = vmatprep.subr.bf16.mxu0 %v3741_v12 }
 0x493   :  { %1515 = vmatpush1.bf16.msra.mxu1 %v3489_v54  ;;  %2418 = vmatpush3.bf16.msra.mxu0 %v3492_v55 }
 0x494   :  { %1516 = vmatprep.subr.bf16.mxu1 %v3495_v56  ;;  %2419 = vmatprep.subr.bf16.mxu0 %v3741_v12 }
 0x497   :  { %1517 = vmatpush1.bf16.msra.mxu1 %v3499_v57  ;;  %2420 = vmatpush3.bf16.msra.mxu0 %v3502_v17 }
 0x498   :  { %1518 = vmatprep.subr.bf16.mxu1 %v3505_v2  ;;  %2421 = vmatprep.subr.bf16.mxu0 %v3741_v12 }
 0x49b   :  { %1519 = vmatpush1.bf16.msra.mxu1 %v3509_v60  ;;  %2422 = vmatpush3.bf16.msra.mxu0 %v3512_v24 }
 0x49c   :  { %1520 = vmatprep.subr.bf16.mxu1 %v3515_v3  ;;  %2423 = vmatprep.subr.bf16.mxu0 %v3741_v12 }
 0x49f   :  { %1521 = vmatpush1.bf16.msra.mxu1 %v3519_v23  ;;  %2424 = vmatpush3.bf16.msra.mxu0 %v3522_v20 }
 0x4a0   :  { %1651 = vmatprep.subr.bf16.mxu1 %v3428_v33  ;;  %2429 = vmatprep.subr.bf16.mxu0 %v3741_v12 }
 0x542   :  { %v1395_v14 = vpop.f32.mrf.mxu1  ;;  %v1438_v10 = vpop.f32.mrf.mxu0 }
 0x543   :  { %v1396_v28 = vadd.f32 %v1395_v14, %v3189_v0 }
 0x544   :  { %v1397_v8 = vpop.f32.mrf.mxu1  ;;  %v2407_v31 = vpop.f32.mrf.mxu0 }
 0x545   :  { %v1445_v36 = vadd.f32 %v1396_v28, %v3748_v25  ;;  %v1398_v26 = vadd.f32 %v1397_v8, %v3218_v9  ;;  %v1439_v8 = vadd.f32 %v1438_v10, %v3262_v51 }
 0x546   :  { %v1399_v19 = vpop.f32.mrf.mxu1  ;;  %v1441_v5 = vpop.f32.mrf.mxu0 }
 0x547   :  { %v2155_v6 = vmul.f32 -1.442695, %v1445_v36  ;;  %v1400_v27 = vadd.f32 %v1399_v19, %v3189_v0  ;;  %v1459_v30 = vadd.f32 %v1398_v26, %v3750_v21  ;;  %v3753_v21 = vld [vmem:[#allocation23_spill] sm:$0xff] }
 0x548   :  { %v2408_v15 = vpop.f32.mrf.mxu0  ;;  %v1401_v22 = vpop.f32.mrf.mxu1 }
 0x549   :  { %2664 = vpow2.f32 %v2155_v6  ;;  %v1446_v39 = vadd.f32 %v1400_v27, %v3749_v29  ;;  %v1402_v42 = vadd.f32 %v1401_v22, %v3218_v9  ;;  %v2157_v34 = vmul.f32 -1.442695, %v1459_v30  ;;  %v3752_v15 = vld [vmem:[#allocation21_spill] sm:$0xff] }
 0x54b   :  { %v2156_v13 = vmul.f32 -1.442695, %v1446_v39  ;;  %v1460_v38 = vadd.f32 %v1402_v42, %v3751_v37 }
 0x54d   :  { %2666 = vpow2.f32 %v2156_v13  ;;  %v2158_v28 = vmul.f32 -1.442695, %v1460_v38  ;;  %v1442_v13 = vadd.f32 %v1441_v5, %v3262_v51 }
 0x54e   :  { %2668 = vpow2.f32 %v2157_v34 }
 0x556   :  { %v2665_v41 = vpop.eup %2664 }
 0x557   :  { %v1453_v14 = vadd.f32 1.0, %v2665_v41 }
 0x559   :  { %2670 = vrcp.f32 %v1453_v14 }
 0x55a   :  { %v2667_v31 = vpop.eup %2666  ;;  %2672 = vpow2.f32 %v2158_v28 }
 0x55b   :  { %v1454_v25 = vadd.f32 1.0, %v2667_v31  ;;  %v2669_v36 = vpop.eup %2668 }
 0x55c   :  { %v1467_v39 = vadd.f32 1.0, %v2669_v36 }
 0x55d   :  { %2674 = vrcp.f32 %v1454_v25 }
 0x566   :  { %v2671_v19 = vpop.eup %2670 }
 0x567   :  { %v1473_v6 = vmul.f32 %v2671_v19, %v1439_v8  ;;  %v2673_v27 = vpop.eup %2672 }
 0x568   :  { %v1468_v42 = vadd.f32 1.0, %v2673_v27 }
 0x569   :  { %v1475_v29 = vadd.f32 %v1473_v6, %v3752_v15 }
 0x56a   :  { %v2675_v26 = vpop.eup %2674 }
 0x56b   :  { %2676 = vtanh.f32 %v1475_v29  ;;  %v1474_v22 = vmul.f32 %v2675_v26, %v1442_v13  ;;  %v3754_v29 = vld [vmem:[#allocation35_spill] sm:$0xff] }
 0x56c   :  { %2678 = vrcp.f32 %v1467_v39 }
 0x56d   :  { %v1476_v30 = vadd.f32 %v1474_v22, %v3753_v21 }
 0x56f   :  { %2680 = vtanh.f32 %v1476_v30 }
 0x570   :  { %2682 = vrcp.f32 %v1468_v42  ;;  %v3755_v42 = vld [vmem:[#allocation37_spill] sm:$0xff] }
 0x578   :  { %v2677_v34 = vpop.eup %2676 }
 0x579   :  { %v1479_v10 = vsub.f32 %v3446_v35, %v2677_v34  ;;  %v2679_v37 = vpop.eup %2678 }
 0x57b   :  { %v1481_v38 = vmul.f32 %v2679_v37, %v1479_v10 }
 0x57c   :  { %v2681_v41 = vpop.eup %2680 }
 0x57d   :  { %v1480_v14 = vsub.f32 %v3448_v40, %v2681_v41  ;;  %v3541_v28 = vadd.f32 %v2677_v34, %v1481_v38  ;;  %v2683_v5 = vpop.eup %2682  ;;  %v3756_v38 = vld [vmem:[#allocation36_spill] sm:$0xff] }
 0x57f   :  { %v1482_v31 = vmul.f32 %v2683_v5, %v1480_v14 }
 0x581   :  { %v3543_v25 = vadd.f32 %v2681_v41, %v1482_v31  ;;  %v3757_v31 = vld [vmem:[#allocation38_spill] sm:$0xff] }
 0x583   :  { %v1505_v36 = vpack.c.bf16 %v3543_v25, %v3541_v28 }
 0x585   :  { %1539 = vmatmul.mubr.bf16.vlgmr.msra.gmra.mxu1 %v1505_v36  ;;  %2426 = vmatmul.mubr.bf16.vlgmr.msra.gmra.mxu0 %v1505_v36 }
 0x586   :  { %1652 = vmatpush1.bf16.msra.mxu1 %v3389_v7  ;;  %2430 = vmatpush3.bf16.msra.mxu0 %v3392_v4 }
 0x587   :  { %1653 = vmatprep.subr.bf16.mxu1 %v3395_v58  ;;  %2431 = vmatprep.subr.bf16.mxu0 %v3741_v12 }
 0x588   :  { %1683 = vmatprep.mubr.bf16.mxu1 %v3742_v32  ;;  %2445 = vmatprep.mubr.msk.bf16.mxu0 %vm2891_vm0, %v3741_v12 }
 0x58a   :  { %1654 = vmatpush1.bf16.msra.mxu1 %v3459_v43  ;;  %2432 = vmatpush3.bf16.msra.mxu0 %v3462_v44 }
 0x58b   :  { %1655 = vmatprep.subr.bf16.mxu1 %v3465_v45  ;;  %2433 = vmatprep.subr.bf16.mxu0 %v3741_v12 }
 0x58e   :  { %1656 = vmatpush1.bf16.msra.mxu1 %v3469_v46  ;;  %2434 = vmatpush3.bf16.msra.mxu0 %v3472_v48 }
 0x58f   :  { %1657 = vmatprep.subr.bf16.mxu1 %v3475_v49  ;;  %2435 = vmatprep.subr.bf16.mxu0 %v3741_v12 }
 0x592   :  { %1658 = vmatpush1.bf16.msra.mxu1 %v3479_v50  ;;  %2436 = vmatpush3.bf16.msra.mxu0 %v3482_v52 }
 0x593   :  { %1659 = vmatprep.subr.bf16.mxu1 %v3485_v53  ;;  %2437 = vmatprep.subr.bf16.mxu0 %v3741_v12 }
 0x596   :  { %1660 = vmatpush1.bf16.msra.mxu1 %v3489_v54  ;;  %2438 = vmatpush3.bf16.msra.mxu0 %v3492_v55 }
 0x597   :  { %1661 = vmatprep.subr.bf16.mxu1 %v3495_v56  ;;  %2439 = vmatprep.subr.bf16.mxu0 %v3741_v12 }
 0x59a   :  { %1662 = vmatpush1.bf16.msra.mxu1 %v3499_v57  ;;  %2440 = vmatpush3.bf16.msra.mxu0 %v3502_v17 }
 0x59b   :  { %1663 = vmatprep.subr.bf16.mxu1 %v3505_v2  ;;  %2441 = vmatprep.subr.bf16.mxu0 %v3741_v12 }
 0x59e   :  { %1664 = vmatpush1.bf16.msra.mxu1 %v3509_v60  ;;  %2442 = vmatpush3.bf16.msra.mxu0 %v3512_v24 }
 0x59f   :  { %1665 = vmatprep.subr.bf16.mxu1 %v3515_v3  ;;  %2443 = vmatprep.subr.bf16.mxu0 %v3741_v12 }
 0x5a2   :  { %1666 = vmatpush1.bf16.msra.mxu1 %v3519_v23  ;;  %2444 = vmatpush3.bf16.msra.mxu0 %v3522_v20 }
 0x5a3   :  { %1796 = vmatprep.subr.bf16.mxu1 %v3428_v33  ;;  %2449 = vmatprep.subr.bf16.mxu0 %v3741_v12 }
 0x645   :  { %v1540_v8 = vpop.f32.mrf.mxu1  ;;  %v1583_v19 = vpop.f32.mrf.mxu0 }
 0x646   :  { %v1541_v6 = vadd.f32 %v1540_v8, %v3189_v0 }
 0x647   :  { %v1542_v27 = vpop.f32.mrf.mxu1  ;;  %v2427_v15 = vpop.f32.mrf.mxu0 }
 0x648   :  { %v1590_v39 = vadd.f32 %v1541_v6, %v3754_v29  ;;  %v1543_v10 = vadd.f32 %v1542_v27, %v3218_v9  ;;  %v1584_v27 = vadd.f32 %v1583_v19, %v3262_v51 }
 0x649   :  { %v1544_v13 = vpop.f32.mrf.mxu1  ;;  %v1586_v26 = vpop.f32.mrf.mxu0 }
 0x64a   :  { %v2159_v22 = vmul.f32 -1.442695, %v1590_v39  ;;  %v1545_v21 = vadd.f32 %v1544_v13, %v3189_v0  ;;  %v1604_v41 = vadd.f32 %v1543_v10, %v3756_v38  ;;  %v1587_v10 = vadd.f32 %v1586_v26, %v3262_v51 }
 0x64b   :  { %v2428_v30 = vpop.f32.mrf.mxu0  ;;  %v1546_v37 = vpop.f32.mrf.mxu1 }
 0x64c   :  { %2684 = vpow2.f32 %v2159_v22  ;;  %v1591_v34 = vadd.f32 %v1545_v21, %v3755_v42  ;;  %v1547_v14 = vadd.f32 %v1546_v37, %v3218_v9  ;;  %v2161_v5 = vmul.f32 -1.442695, %v1604_v41  ;;  %v3758_v42 = vld [vmem:[#allocation20_spill] sm:$0xff]  ;;  %v3759_v41 = vld [vmem:[#allocation22_spill] sm:$0xff] }
 0x64e   :  { %v2160_v33 = vmul.f32 -1.442695, %v1591_v34  ;;  %v1605_v36 = vadd.f32 %v1547_v14, %v3757_v31 }
 0x650   :  { %2686 = vpow2.f32 %v2160_v33  ;;  %v2162_v15 = vmul.f32 -1.442695, %v1605_v36 }
 0x651   :  { %2688 = vpow2.f32 %v2161_v5 }
 0x659   :  { %v2685_v8 = vpop.eup %2684 }
 0x65a   :  { %v1598_v6 = vadd.f32 1.0, %v2685_v8 }
 0x65c   :  { %2690 = vrcp.f32 %v1598_v6 }
 0x65d   :  { %v2687_v29 = vpop.eup %2686  ;;  %2692 = vpow2.f32 %v2162_v15 }
 0x65e   :  { %v1599_v39 = vadd.f32 1.0, %v2687_v29  ;;  %v2689_v13 = vpop.eup %2688 }
 0x65f   :  { %v1612_v33 = vadd.f32 1.0, %v2689_v13 }
 0x660   :  { %2694 = vrcp.f32 %v1599_v39 }
 0x669   :  { %v2691_v22 = vpop.eup %2690 }
 0x66a   :  { %v1618_v21 = vmul.f32 %v2691_v22, %v1584_v27  ;;  %v2693_v30 = vpop.eup %2692 }
 0x66b   :  { %v1613_v5 = vadd.f32 1.0, %v2693_v30 }
 0x66c   :  { %v1620_v34 = vadd.f32 %v1618_v21, %v3758_v42  ;;  %v3761_v42 = vld [vmem:[#allocation26_spill] sm:$0xff] }
 0x66d   :  { %v2695_v37 = vpop.eup %2694 }
 0x66e   :  { %2696 = vtanh.f32 %v1620_v34  ;;  %v1619_v38 = vmul.f32 %v2695_v37, %v1587_v10 }
 0x66f   :  { %2698 = vrcp.f32 %v1612_v33 }
 0x670   :  { %v1621_v14 = vadd.f32 %v1619_v38, %v3759_v41  ;;  %v3762_v41 = vld [vmem:[#allocation30_spill] sm:$0xff] }
 0x672   :  { %2700 = vtanh.f32 %v1621_v14 }
 0x673   :  { %2702 = vrcp.f32 %v1613_v5 }
 0x67b   :  { %v2697_v31 = vpop.eup %2696 }
 0x67c   :  { %v1624_v19 = vsub.f32 %v3541_v28, %v2697_v31  ;;  %v2699_v36 = vpop.eup %2698 }
 0x67e   :  { %v1626_v8 = vmul.f32 %v2699_v36, %v1624_v19 }
 0x67f   :  { %v2701_v6 = vpop.eup %2700 }
 0x680   :  { %v1625_v15 = vsub.f32 %v3543_v25, %v2701_v6  ;;  %v3596_v29 = vadd.f32 %v2697_v31, %v1626_v8  ;;  %v2703_v26 = vpop.eup %2702 }
 0x682   :  { %v1627_v39 = vmul.f32 %v2703_v26, %v1625_v15 }
 0x684   :  { %v3598_v13 = vadd.f32 %v2701_v6, %v1627_v39 }
 0x686   :  { %v1650_v27 = vpack.c.bf16 %v3598_v13, %v3596_v29 }
 0x688   :  { %1684 = vmatmul.mubr.bf16.vlgmr.msra.gmra.mxu1 %v1650_v27  ;;  %2446 = vmatmul.mubr.bf16.vlgmr.msra.gmra.mxu0 %v1650_v27 }
 0x689   :  { %1797 = vmatpush1.bf16.msra.mxu1 %v3389_v7  ;;  %2450 = vmatpush3.bf16.msra.mxu0 %v3392_v4 }
 0x68a   :  { %1798 = vmatprep.subr.bf16.mxu1 %v3395_v58  ;;  %2451 = vmatprep.subr.bf16.mxu0 %v3741_v12 }
 0x68b   :  { %1828 = vmatprep.mubr.bf16.mxu1 %v3742_v32  ;;  %2465 = vmatprep.mubr.msk.bf16.mxu0 %vm2891_vm0, %v3741_v12 }
 0x68d   :  { %1799 = vmatpush1.bf16.msra.mxu1 %v3459_v43  ;;  %2452 = vmatpush3.bf16.msra.mxu0 %v3462_v44 }
 0x68e   :  { %1800 = vmatprep.subr.bf16.mxu1 %v3465_v45  ;;  %2453 = vmatprep.subr.bf16.mxu0 %v3741_v12 }
 0x691   :  { %1801 = vmatpush1.bf16.msra.mxu1 %v3469_v46  ;;  %2454 = vmatpush3.bf16.msra.mxu0 %v3472_v48 }
 0x692   :  { %1802 = vmatprep.subr.bf16.mxu1 %v3475_v49  ;;  %2455 = vmatprep.subr.bf16.mxu0 %v3741_v12 }
 0x695   :  { %1803 = vmatpush1.bf16.msra.mxu1 %v3479_v50  ;;  %2456 = vmatpush3.bf16.msra.mxu0 %v3482_v52 }
 0x696   :  { %1804 = vmatprep.subr.bf16.mxu1 %v3485_v53  ;;  %2457 = vmatprep.subr.bf16.mxu0 %v3741_v12 }
 0x699   :  { %1805 = vmatpush1.bf16.msra.mxu1 %v3489_v54  ;;  %2458 = vmatpush3.bf16.msra.mxu0 %v3492_v55 }
 0x69a   :  { %1806 = vmatprep.subr.bf16.mxu1 %v3495_v56  ;;  %2459 = vmatprep.subr.bf16.mxu0 %v3741_v12 }
 0x69d   :  { %1807 = vmatpush1.bf16.msra.mxu1 %v3499_v57  ;;  %2460 = vmatpush3.bf16.msra.mxu0 %v3502_v17 }
 0x69e   :  { %1808 = vmatprep.subr.bf16.mxu1 %v3505_v2  ;;  %2461 = vmatprep.subr.bf16.mxu0 %v3741_v12 }
 0x6a1   :  { %1809 = vmatpush1.bf16.msra.mxu1 %v3509_v60  ;;  %2462 = vmatpush3.bf16.msra.mxu0 %v3512_v24 }
 0x6a2   :  { %1810 = vmatprep.subr.bf16.mxu1 %v3515_v3  ;;  %2463 = vmatprep.subr.bf16.mxu0 %v3741_v12 }
 0x6a5   :  { %1811 = vmatpush1.bf16.msra.mxu1 %v3519_v23  ;;  %2464 = vmatpush3.bf16.msra.mxu0 %v3522_v20 }
 0x6a6   :  { %2469 = vmatprep.subr.bf16.mxu1 %v3741_v12 }
 0x748   :  { %v1685_v32 = vpop.f32.mrf.mxu1  ;;  %v1728_v7 = vpop.f32.mrf.mxu0 }
 0x749   :  { %v1686_v4 = vadd.f32 %v1685_v32, %v3189_v0  ;;  %v1729_v22 = vadd.f32 %v1728_v7, %v3262_v51 }
 0x74a   :  { %v1687_v58 = vpop.f32.mrf.mxu1  ;;  %v2447_v43 = vpop.f32.mrf.mxu0 }
 0x74b   :  { %v1735_v44 = vadd.f32 %v1686_v4, %v3239_v62  ;;  %v1688_v54 = vadd.f32 %v1687_v58, %v3218_v9  ;;  %v3760_v62 = vld [vmem:[#allocation39_spill] sm:$0xff]  ;;  %v2577_v58 = vld [vmem:[#allocation11 + $0x30] sm:$0xff]   ;;  %v2578_v43 = vld [vmem:[#allocation11 + $0x28] sm:$0xff]  }
 0x74c   :  { %v1689_v45 = vpop.f32.mrf.mxu1  ;;  %v1731_v46 = vpop.f32.mrf.mxu0  ;;  %v2576_v4 = vld [vmem:[#allocation11 + $0x38] sm:$0xff]  }
 0x74d   :  { %v2163_v48 = vmul.f32 -1.442695, %v1735_v44  ;;  %v1690_v49 = vadd.f32 %v1689_v45, %v3189_v0  ;;  %v1749_v56 = vadd.f32 %v1688_v54, %v3242_v1  ;;  %v1732_v10 = vadd.f32 %v1731_v46, %v3262_v51  ;;  %v2579_v44 = vld [vmem:[#allocation11 + $0x20] sm:$0xff]   ;;  %v2580_v45 = vld [vmem:[#allocation11 + $0x18] sm:$0xff]   ;;  %v2581_v46 = vld [vmem:[#allocation11 + $0x10] sm:$0xff]  }
 0x74e   :  { %v2448_v50 = vpop.f32.mrf.mxu0  ;;  %v1691_v55 = vpop.f32.mrf.mxu1 }
 0x74f   :  { %2704 = vpow2.f32 %v2163_v48  ;;  %v1736_v52 = vadd.f32 %v1690_v49, %v3245_v61  ;;  %v1692_v57 = vadd.f32 %v1691_v55, %v3218_v9  ;;  %v2165_v17 = vmul.f32 -1.442695, %v1749_v56  ;;  %v2582_v48 = vld [vmem:[#allocation11 + $0x8] sm:$0xff]   ;;  %v2583_v49 = vld [vmem:[#allocation11] sm:$0xff]  }
 0x750   :  { %v3763_v56 = vld [vmem:[#allocation40_spill] sm:$0xff] }
 0x751   :  { %v2164_v53 = vmul.f32 -1.442695, %v1736_v52  ;;  %v1750_v2 = vadd.f32 %v1692_v57, %v3760_v62 }
 0x753   :  { %2706 = vpow2.f32 %v2164_v53  ;;  %v2166_v3 = vmul.f32 -1.442695, %v1750_v2 }
 0x754   :  { %2708 = vpow2.f32 %v2165_v17 }
 0x75c   :  { %v2705_v60 = vpop.eup %2704 }
 0x75d   :  { %v1743_v24 = vadd.f32 1.0, %v2705_v60 }
 0x75f   :  { %2710 = vrcp.f32 %v1743_v24 }
 0x760   :  { %v2707_v23 = vpop.eup %2706  ;;  %2712 = vpow2.f32 %v2166_v3  ;;  %v3764_v3 = vld [vmem:[#allocation42_spill] sm:$0xff] }
 0x761   :  { %v1744_v20 = vadd.f32 1.0, %v2707_v23  ;;  %v2709_v61 = vpop.eup %2708 }
 0x762   :  { %v1757_v33 = vadd.f32 1.0, %v2709_v61 }
 0x763   :  { %2714 = vrcp.f32 %v1744_v20 }
 0x76c   :  { %v2711_v21 = vpop.eup %2710 }
 0x76d   :  { %v1763_v30 = vmul.f32 %v2711_v21, %v1729_v22  ;;  %v2713_v1 = vpop.eup %2712  ;;  %v3765_v22 = vld [vmem:[#allocation41_spill] sm:$0xff] }
 0x76e   :  { %v1758_v5 = vadd.f32 1.0, %v2713_v1 }
 0x76f   :  { %v1765_v34 = vadd.f32 %v1763_v30, %v3761_v42  ;;  %v3766_v42 = vld [vmem:[#allocation43_spill] sm:$0xff] }
 0x770   :  { %v2715_v37 = vpop.eup %2714 }
 0x771   :  { %2716 = vtanh.f32 %v1765_v34  ;;  %v1764_v38 = vmul.f32 %v2715_v37, %v1732_v10 }
 0x772   :  { %2718 = vrcp.f32 %v1757_v33 }
 0x773   :  { %v1766_v14 = vadd.f32 %v1764_v38, %v3762_v41 }
 0x775   :  { %2720 = vtanh.f32 %v1766_v14 }
 0x776   :  { %2722 = vrcp.f32 %v1758_v5 }
 0x77e   :  { %v2717_v31 = vpop.eup %2716 }
 0x77f   :  { %v1769_v19 = vsub.f32 %v3596_v29, %v2717_v31  ;;  %v2719_v36 = vpop.eup %2718 }
 0x781   :  { %v1771_v8 = vmul.f32 %v2719_v36, %v1769_v19  ;;  %v3767_v36 = vld [vmem:[#allocation24_spill] sm:$0xff] }
 0x782   :  { %v2721_v6 = vpop.eup %2720 }
 0x783   :  { %v1770_v15 = vsub.f32 %v3598_v13, %v2721_v6  ;;  %v3650_v26 = vadd.f32 %v2717_v31, %v1771_v8  ;;  %v2723_v39 = vpop.eup %2722 }
 0x785   :  { %v1772_v27 = vmul.f32 %v2723_v39, %v1770_v15 }
 0x787   :  { %v3652_v32 = vadd.f32 %v2721_v6, %v1772_v27  ;;  %v3768_v27 = vld [vmem:[#allocation28_spill] sm:$0xff] }
 0x789   :  { %v1795_v7 = vpack.c.bf16 %v3652_v32, %v3650_v26 }
 0x78b   :  { %1829 = vmatmul.mubr.bf16.vlgmr.msra.gmra.mxu1 %v1795_v7  ;;  %2466 = vmatmul.mubr.bf16.vlgmr.msra.gmra.mxu0 %v1795_v7 }
 0x78c   :  { %2485 = vmatprep.mubr.msk.bf16.mxu1 %vm2891_vm0, %v3741_v12  ;;  %2470 = vmatpush3.bf16.msra.mxu1 %v2576_v4 }
 0x78d   :  { %2471 = vmatprep.subr.bf16.mxu1 %v3741_v12 }
 0x790   :  { %2472 = vmatpush3.bf16.msra.mxu1 %v2577_v58  ;;  %v1057_v58 = vmax.f32 %v3273_v11, %v3328_v16 }
 0x791   :  { %2473 = vmatprep.subr.bf16.mxu1 %v3741_v12 }
 0x794   :  { %2474 = vmatpush3.bf16.msra.mxu1 %v2578_v43  ;;  %v1202_v43 = vmax.f32 %v1057_v58, %v3383_v59 }
 0x795   :  { %2475 = vmatprep.subr.bf16.mxu1 %v3741_v12 }
 0x798   :  { %2476 = vmatpush3.bf16.msra.mxu1 %v2579_v44  ;;  %v1058_v44 = vmax.f32 %v3275_v18, %v3330_v47 }
 0x799   :  { %2477 = vmatprep.subr.bf16.mxu1 %v3741_v12 }
 0x79c   :  { %2478 = vmatpush3.bf16.msra.mxu1 %v2580_v45 }
 0x79d   :  { %2479 = vmatprep.subr.bf16.mxu1 %v3741_v12 }
 0x7a0   :  { %2480 = vmatpush3.bf16.msra.mxu1 %v2581_v46  ;;  %v1203_v46 = vmax.f32 %v1058_v44, %v3385_v63 }
 0x7a1   :  { %2481 = vmatprep.subr.bf16.mxu1 %v3741_v12 }
 0x7a4   :  { %2482 = vmatpush3.bf16.msra.mxu1 %v2582_v48 }
 0x7a5   :  { %2483 = vmatprep.subr.bf16.mxu1 %v3741_v12 }
 0x7a8   :  { %2484 = vmatpush3.bf16.msra.mxu1 %v2583_v49 }
 0x84b   :  { %v1830_v50 = vpop.f32.mrf.mxu1  ;;  %v1873_v52 = vpop.f32.mrf.mxu0 }
 0x84c   :  { %v1831_v53 = vadd.f32 %v1830_v50, %v3189_v0  ;;  %v1874_v14 = vadd.f32 %v1873_v52, %v3262_v51  ;;  %v1348_v52 = vmax.f32 %v1203_v46, %v3448_v40 }
 0x84d   :  { %v1832_v54 = vpop.f32.mrf.mxu1  ;;  %v2467_v55 = vpop.f32.mrf.mxu0 }
 0x84e   :  { %v1880_v57 = vadd.f32 %v1831_v53, %v3763_v56  ;;  %v1833_v12 = vadd.f32 %v1832_v54, %v3218_v9  ;;  %v1493_v16 = vmax.f32 %v1348_v52, %v3543_v25  ;;  %v2171_v25 = vld [vmem:[%s3705_s6] ss:$0 sm:$0xff] }
 0x84f   :  { %v1834_v17 = vpop.f32.mrf.mxu1  ;;  %v1876_v62 = vpop.f32.mrf.mxu0 }
 0x850   :  { %v2167_v2 = vmul.f32 -1.442695, %v1880_v57  ;;  %v1835_v60 = vadd.f32 %v1834_v17, %v3189_v0  ;;  %v1894_v21 = vadd.f32 %v1833_v12, %v3765_v22  ;;  %v1877_v6 = vadd.f32 %v1876_v62, %v3262_v51 }
 0x851   :  { %v2468_v24 = vpop.f32.mrf.mxu0  ;;  %v1836_v61 = vpop.f32.mrf.mxu1  ;;  %v1347_v51 = vmax.f32 %v1202_v43, %v3446_v35  ;;  %v1638_v63 = vmax.f32 %v1493_v16, %v3598_v13 }
 0x852   :  { %2724 = vpow2.f32 %v2167_v2  ;;  %v1881_v23 = vadd.f32 %v1835_v60, %v3764_v3  ;;  %v1837_v30 = vadd.f32 %v1836_v61, %v3218_v9  ;;  %v2169_v1 = vmul.f32 -1.442695, %v1894_v21 }
 0x853   :  { %v1492_v50 = vmax.f32 %v1347_v51, %v3541_v28  ;;  %v1783_v28 = vmax.f32 %v1638_v63, %v3652_v32 }
 0x854   :  { %v2168_v20 = vmul.f32 -1.442695, %v1881_v23  ;;  %v1895_v34 = vadd.f32 %v1837_v30, %v3766_v42 }
 0x855   :  { %v1637_v11 = vmax.f32 %v1492_v50, %v3596_v29 }
 0x856   :  { %2726 = vpow2.f32 %v2168_v20  ;;  %v2170_v0 = vmul.f32 -1.442695, %v1895_v34 }
 0x857   :  { %2728 = vpow2.f32 %v2169_v1  ;;  %v1782_v35 = vmax.f32 %v1637_v11, %v3650_v26 }
 0x85f   :  { %v2725_v33 = vpop.eup %2724 }
 0x860   :  { %v1888_v10 = vadd.f32 1.0, %v2725_v33 }
 0x862   :  { %2730 = vrcp.f32 %v1888_v10 }
 0x863   :  { %v2727_v37 = vpop.eup %2726  ;;  %2732 = vpow2.f32 %v2170_v0 }
 0x864   :  { %v1889_v38 = vadd.f32 1.0, %v2727_v37  ;;  %v2729_v41 = vpop.eup %2728 }
 0x865   :  { %v1902_v8 = vadd.f32 1.0, %v2729_v41 }
 0x866   :  { %2734 = vrcp.f32 %v1889_v38 }
 0x86f   :  { %v2731_v5 = vpop.eup %2730 }
 0x870   :  { %v1908_v31 = vmul.f32 %v2731_v5, %v1874_v14  ;;  %v2733_v19 = vpop.eup %2732 }
 0x871   :  { %v1903_v4 = vadd.f32 1.0, %v2733_v19 }
 0x872   :  { %v1910_v9 = vadd.f32 %v1908_v31, %v3767_v36 }
 0x873   :  { %v2735_v15 = vpop.eup %2734 }
 0x874   :  { %2736 = vtanh.f32 %v1910_v9  ;;  %v1909_v39 = vmul.f32 %v2735_v15, %v1877_v6 }
 0x875   :  { %2738 = vrcp.f32 %v1902_v8 }
 0x876   :  { %v1911_v7 = vadd.f32 %v1909_v39, %v3768_v27 }
 0x878   :  { %2740 = vtanh.f32 %v1911_v7 }
 0x879   :  { %2742 = vrcp.f32 %v1903_v4 }
 0x881   :  { %v2737_v45 = vpop.eup %2736 }
 0x882   :  { %v1914_v48 = vsub.f32 %v3650_v26, %v2737_v45  ;;  %v2739_v49 = vpop.eup %2738 }
 0x884   :  { %v1916_v53 = vmul.f32 %v2739_v49, %v1914_v48 }
 0x885   :  { %v2741_v54 = vpop.eup %2740 }
 0x886   :  { %v1918_v59 = vadd.f32 %v2737_v45, %v1916_v53  ;;  %v1915_v18 = vsub.f32 %v3652_v32, %v2741_v54  ;;  %v2743_v47 = vpop.eup %2742 }
 0x888   :  { %v1917_v55 = vmul.f32 %v2743_v47, %v1915_v18  ;;  %v1927_v56 = vmax.f32 %v1782_v35, %v1918_v59 }
 0x88a   :  { %v1919_v57 = vadd.f32 %v2741_v54, %v1917_v55  ;;  %2744 = vtanh.f32 %v1927_v56 }
 0x88c   :  { %v1928_v40 = vmax.f32 %v1783_v28, %v1919_v57 }
 0x88e   :  { %2746 = vtanh.f32 %v1928_v40 }
 0x897   :  { %v2745_v17 = vpop.eup %2744 }
 0x89b   :  { %v2747_v29 = vpop.eup %2746 }
 0x89c   :  { %v1942_v62 = vpack.c.bf16 %v2747_v29, %v2745_v17 }
 0x89e   :  { %2486 = vmatmul.mubr.bf16.vlgmr.msra.gmra.mxu1 %v1942_v62 }
 0x95e   :  { %v2048_v2 = vpop.f32.mrf.mxu1 }
 0x95f   :  { %v2049_v26 = vadd.f32 %v2171_v25, %v2048_v2 }
 0x960   :  { %v2487_v60 = vpop.f32.mrf.mxu1 }
 0x961   :  { %2055 = vst [vmem:[#allocation13] sm:$0xff] %v2049_v26 }
 0x962   :  { %v2051_v13 = vpop.f32.mrf.mxu1 }
 0x963   :  { %v2052_v32 = vadd.f32 %v2171_v25, %v2051_v13 }
 0x964   :  { %v2488_v24 = vpop.f32.mrf.mxu1 }
 0x965   :  { %2056 = vst [vmem:[#allocation13 + $0x8] sm:$0xff] %v2052_v32 }
 0x966   :  { %2863 = shalt.err (!%p2860_p10)
}
 0x967   :  { %s2893_s28 = smov 128   ;;  %s2894_s6 = smov 8  }
 0x968   :  { %2068 = dma.vmem_to_hbm [thread:$0]  %s2063_s26, 256, %s3706_s7, [#allocation7], %s2893_s28, %s2893_s28, %s2894_s6  }
 0x969   :  { %2878 = dma.done.wait [#allocation7], 256  }
 0x96a   :  { %2879 = vsyncadd [#allocation7], 4294967040 }
 0x96b   :  { %2072 = vsyncpa [#allocation6], 1 }
 0x96c   :  { %2073 = vsyncpa [#allocation9], 1 }
 0x96d   :  { %2074 = vsyncpa [#allocation12], 1 }
 0x96e   :  { %2075 = vsyncpa [#allocation7], 1 }

</bundles_post_ra>
